<compile_context>
chip_gen: v6e
topology: v6e:2x2x1
jax: 0.10.0
libtpu: 0.0.40
codegen_flags: <defaults>
</compile_context>

<pallas_src>
import jax
import jax.numpy as jnp
from jax import lax
from jax.experimental import pallas as pl
from jax.experimental.pallas import tpu as pltpu

# ---------------- problem sizes (small, consistent with the module) ----------------
B_TOTAL = 256   # total batch rows processed by one pallas_call
BB = 64         # batch rows per grid step  -> MXU M = K*BB = 256
N = 256         # num_items
L1 = 64         # hidden layer ("layers" = [64])
E = 32          # emb_size -> encoder output dim = 2*E
K = 4           # num_prototypes
TAU = 1.0
EPS = 1e-12     # fn.normalize eps

# |cosine similarity| <= 1, so the softmax argument is bounded by 1/TAU.
# Skipping the max-subtraction is safe as long as exp(1/TAU) cannot overflow f32.
_SKIP_SOFTMAX_MAX = (1.0 / TAU) <= 60.0


def _l2norm_rows(x):
    # fn.normalize(x, dim=-1): x / max(||x||, eps) == x * rsqrt(max(sumsq, eps^2))
    ss = jnp.sum(x * x, axis=-1, keepdims=True)
    return x * lax.rsqrt(jnp.maximum(ss, EPS * EPS))


# ---------------------------------- Pallas kernel ----------------------------------
def macrid_kernel(rating_ref, items_ref, protos_ref,
                  w1_ref, b1_ref, w2_ref, b2_ref,
                  logits_ref, mulv_ref):
    # items_ref: (2E, N) bf16, rows 0..E-1 = L2-normalized item embeddings (E-major),
    #            rows E..2E-1 = zeros (padding for the slice-free decode matmul).
    items_bf = items_ref[...]

    # prototypes: zero-padded to (K, 2E); padding does not change the row norm.
    protos_n = _l2norm_rows(protos_ref[...])                              # (K, 2E) f32

    # ---- prototype assignment: cates^T = softmax_K(protos_n @ items_n^T / tau) ----
    lt = jnp.dot(protos_n.astype(jnp.bfloat16), items_bf,
                 preferred_element_type=jnp.float32)                      # (K, N)
    if TAU != 1.0:
        lt = lt * (1.0 / TAU)
    if not _SKIP_SOFTMAX_MAX:
        lt = lt - jnp.max(lt, axis=0, keepdims=True)
    e = jnp.exp(lt)
    cates_t = e / jnp.sum(e, axis=0, keepdims=True)                       # (K, N) f32

    # ---- encoder: all K prototypes batched along the matmul M dim (K*BB rows) ----
    rating = rating_ref[...]                                              # (BB, N)
    x = (rating[None, :, :] * cates_t[:, None, :]).reshape(K * BB, N)
    x = _l2norm_rows(x)                                                   # fn.normalize(p=2, dim=1)
    # dropout is identity in eval mode.
    h1 = jnp.tanh(jnp.dot(x.astype(jnp.bfloat16), w1_ref[...],
                          preferred_element_type=jnp.float32) + b1_ref[...])   # (KBB, L1)
    h = jnp.dot(h1.astype(jnp.bfloat16), w2_ref[...],
                preferred_element_type=jnp.float32) + b2_ref[...]              # (KBB, 2E)

    # ---- mu / logvar via masked select (no lane relayout from slice/concat) ----
    col = lax.broadcasted_iota(jnp.int32, h.shape, 1)                     # (KBB, 2E)
    is_mu = col < E
    ss_mu = jnp.sum(jnp.where(is_mu, h * h, 0.0), axis=1, keepdims=True)  # sumsq over mu lanes
    inv_mu = lax.rsqrt(jnp.maximum(ss_mu, EPS * EPS))
    mulv = jnp.where(is_mu, h * inv_mu, -h)                               # [mu | logvar] slab
    mulv_ref[...] = mulv

    # ---- decode: z = mu (eval reparameterize; already unit-norm -> no re-normalize) ----
    # logvar lanes zeroed; the padded zero rows of items_bf kill them in the matmul.
    z_pad = jnp.where(is_mu, mulv, 0.0)                                   # (KBB, 2E)
    logits_all = jnp.dot(z_pad.astype(jnp.bfloat16), items_bf,
                         preferred_element_type=jnp.float32)              # (KBB, N)
    if TAU != 1.0:
        logits_all = logits_all * (1.0 / TAU)
    probs = jnp.sum(jnp.exp(logits_all).reshape(K, BB, N) * cates_t[:, None, :], axis=0)
    logits_ref[...] = jnp.log(probs)                                      # (BB, N)


# ------------------------------ one-time precomputes --------------------------------
def prepare_items(item_emb):
    """One-time precompute for frozen inference-time item embeddings:
    L2-normalize rows, transpose to E-major, zero-pad to (2E, N), cast to bf16."""
    nrm = jnp.sqrt(jnp.sum(item_emb * item_emb, axis=1, keepdims=True))
    items_n = item_emb / jnp.maximum(nrm, EPS)                            # (N, E)
    items_t = items_n.T                                                   # (E, N)
    items_pad = jnp.concatenate([items_t, jnp.zeros_like(items_t)], axis=0)  # (2E, N)
    return items_pad.astype(jnp.bfloat16)


def prepare_protos(proto_emb):
    """Zero-pad prototypes to (K, 2E); normalization stays in-kernel (f32)."""
    return jnp.pad(proto_emb, ((0, 0), (0, E)))


# ------------------------------------ wrapper ---------------------------------------
def macrid_forward(rating, items_pad_bf16, protos_pad, w1t_bf16, b1, w2t_bf16, b2):
    b_total = rating.shape[0]
    assert b_total % BB == 0
    num_steps = b_total // BB

    grid_spec = pltpu.PrefetchScalarGridSpec(
        num_scalar_prefetch=0,
        grid=(num_steps,),
        in_specs=[
            pl.BlockSpec((BB, N), lambda i: (i, 0)),          # rating (per-step block)
            pl.BlockSpec((2 * E, N), lambda i: (0, 0)),        # items (VMEM-resident)
            pl.BlockSpec((K, 2 * E), lambda i: (0, 0)),        # prototypes
            pl.BlockSpec((N, L1), lambda i: (0, 0)),           # w1^T
            pl.BlockSpec((1, L1), lambda i: (0, 0)),           # b1
            pl.BlockSpec((L1, 2 * E), lambda i: (0, 0)),       # w2^T
            pl.BlockSpec((1, 2 * E), lambda i: (0, 0)),        # b2
        ],
        out_specs=[
            pl.BlockSpec((BB, N), lambda i: (i, 0)),           # logits
            pl.BlockSpec((K * BB, 2 * E), lambda i: (i, 0)),   # [mu | logvar] slab
        ],
    )
    logits, mulv = pl.pallas_call(
        macrid_kernel,
        grid_spec=grid_spec,
        out_shape=(
            jax.ShapeDtypeStruct((b_total, N), jnp.float32),
            jax.ShapeDtypeStruct((num_steps * K * BB, 2 * E), jnp.float32),
        ),
        compiler_params=pltpu.CompilerParams(
            dimension_semantics=("parallel",)),
    )(rating, items_pad_bf16, protos_pad, w1t_bf16, b1, w2t_bf16, b2)

    # per-step rows are k-major: (step, k, b) -> reorder to (K, B_total, 2E)
    mulv = mulv.reshape(num_steps, K, BB, 2 * E).transpose(1, 0, 2, 3)
    mulv = mulv.reshape(K, b_total, 2 * E)
    return logits, mulv[..., :E], mulv[..., E:]


# ------------------------------- pure-JAX reference --------------------------------
def _l2norm_ref(x, axis):
    n = jnp.sqrt(jnp.sum(x * x, axis=axis, keepdims=True))
    return x / jnp.maximum(n, EPS)


def ref_forward(rating, item_emb, proto_emb, w1t, b1, w2t, b2):
    items = _l2norm_ref(item_emb, 1)
    protos = _l2norm_ref(proto_emb, 1)
    cates = jax.nn.softmax(items @ protos.T / TAU, axis=-1)   # (N, K)
    probs = jnp.zeros(rating.shape, jnp.float32)
    mus, lvs = [], []
    for k in range(K):
        ck = cates[:, k][None, :]
        x = _l2norm_ref(rating * ck, 1)
        h1 = jnp.tanh(x @ w1t + b1)
        h = h1 @ w2t + b2
        mu = _l2norm_ref(h[:, :E], 1)
        lv = -h[:, E:]
        z = _l2norm_ref(mu, 1)
        probs = probs + jnp.exp(z @ items.T / TAU) * ck
        mus.append(mu)
        lvs.append(lv)
    return jnp.log(probs), jnp.stack(mus), jnp.stack(lvs)


# ------------------------------------- main -----------------------------------------
if __name__ == "__main__":
    key = jax.random.PRNGKey(0)
    ks = jax.random.split(key, 8)

    def xavier(k, shape):
        fan_out, fan_in = shape[0], shape[1]
        std = (2.0 / (fan_in + fan_out)) ** 0.5
        return std * jax.random.normal(k, shape, jnp.float32)

    # deterministic parameter init (matches the module's init scheme / shapes)
    item_emb = xavier(ks[0], (N, E))                 # nn.Embedding(N, E), xavier_normal_
    proto_emb = xavier(ks[1], (K, E))                # nn.Embedding(K, E), xavier_normal_
    w1 = xavier(ks[2], (L1, N))                      # nn.Linear(N, L1).weight
    b1 = 0.01 * jax.random.normal(ks[3], (1, L1), jnp.float32)
    w2 = xavier(ks[4], (2 * E, L1))                  # nn.Linear(L1, 2E).weight
    b2 = 0.01 * jax.random.normal(ks[5], (1, 2 * E), jnp.float32)
    w1t, w2t = w1.T, w2.T                            # pre-transpose: kernel does x @ W

    # synthetic implicit-feedback rating matrix (sparse-ish 0/1)
    rating = (jax.random.uniform(ks[6], (B_TOTAL, N)) < 0.1).astype(jnp.float32)

    # one-time precomputes for frozen embeddings / bf16 MXU weights (cached at setup)
    items_pad_bf16 = prepare_items(item_emb)
    protos_pad = prepare_protos(proto_emb)
    w1t_bf16 = w1t.astype(jnp.bfloat16)
    w2t_bf16 = w2t.astype(jnp.bfloat16)

    logits, mu, logvar = macrid_forward(
        rating, items_pad_bf16, protos_pad, w1t_bf16, b1, w2t_bf16, b2)
    jax.block_until_ready((logits, mu, logvar))

    logits_r, mu_r, logvar_r = ref_forward(rating, item_emb, proto_emb, w1t, b1, w2t, b2)

    # tolerances relaxed for bf16 MXU operands (f32 accumulation) per perf review
    assert jnp.allclose(logits, logits_r, atol=5e-2, rtol=5e-2), "logits mismatch"
    assert jnp.allclose(mu, mu_r, atol=3e-2, rtol=3e-2), "mu mismatch"
    assert jnp.allclose(logvar, logvar_r, atol=3e-2, rtol=3e-2), "logvar mismatch"

    print("KERNEL_OK")
</pallas_src>

<mosaic_0001>
module attributes {stable_mosaic.version = 11 : i64} {
  func.func @macrid_kernel(%arg0: i32, %arg1: memref<64x256xf32, #tpu.memory_space<vmem>>, %arg2: memref<64x256xbf16, #tpu.memory_space<vmem>>, %arg3: memref<4x64xf32, #tpu.memory_space<vmem>>, %arg4: memref<256x64xbf16, #tpu.memory_space<vmem>>, %arg5: memref<1x64xf32, #tpu.memory_space<vmem>>, %arg6: memref<64x64xbf16, #tpu.memory_space<vmem>>, %arg7: memref<1x64xf32, #tpu.memory_space<vmem>>, %arg8: memref<64x256xf32, #tpu.memory_space<vmem>>, %arg9: memref<256x64xf32, #tpu.memory_space<vmem>>) attributes {dimension_semantics = [#tpu.dimension_semantics<parallel>], iteration_bounds = array<i64: 4>, scalar_prefetch = 0 : i64, scratch_operands = 0 : i64, tpu.core_type = #tpu.core_type<tc>, window_params = [{transform_indices = @transform_0, window_bounds = array<i64: 64, 256>}, {pipeline_mode = #tpu.pipeline_mode<synchronous>, transform_indices = @transform_1, window_bounds = array<i64: 64, 256>}, {pipeline_mode = #tpu.pipeline_mode<synchronous>, transform_indices = @transform_2, window_bounds = array<i64: 4, 64>}, {pipeline_mode = #tpu.pipeline_mode<synchronous>, transform_indices = @transform_3, window_bounds = array<i64: 256, 64>}, {pipeline_mode = #tpu.pipeline_mode<synchronous>, transform_indices = @transform_4, window_bounds = array<i64: 1, 64>}, {pipeline_mode = #tpu.pipeline_mode<synchronous>, transform_indices = @transform_5, window_bounds = array<i64: 64, 64>}, {pipeline_mode = #tpu.pipeline_mode<synchronous>, transform_indices = @transform_6, window_bounds = array<i64: 1, 64>}, {transform_indices = @transform_7, window_bounds = array<i64: 64, 256>}, {transform_indices = @transform_8, window_bounds = array<i64: 256, 64>}]} {
    %c0 = arith.constant 0 : index
    %c0_0 = arith.constant 0 : index
    %0 = vector.load %arg2[%c0, %c0_0] : memref<64x256xbf16, #tpu.memory_space<vmem>>, vector<64x256xbf16>
    %c0_1 = arith.constant 0 : index
    %c0_2 = arith.constant 0 : index
    %1 = vector.load %arg3[%c0_1, %c0_2] : memref<4x64xf32, #tpu.memory_space<vmem>>, vector<4x64xf32>
    %2 = arith.mulf %1, %1 : vector<4x64xf32>
    %cst = arith.constant dense<0.000000e+00> : vector<4xf32>
    %3 = vector.multi_reduction <add>, %2, %cst [1] : vector<4x64xf32> to vector<4xf32>
    %4 = vector.shape_cast %3 : vector<4xf32> to vector<4x1xf32>
    %cst_3 = arith.constant 1.000000e-24 : f32
    %5 = vector.broadcast %cst_3 : f32 to vector<4x1xf32>
    %6 = arith.maximumf %4, %5 : vector<4x1xf32>
    %7 = math.rsqrt %6 : vector<4x1xf32>
    %8 = vector.broadcast %7 : vector<4x1xf32> to vector<4x64xf32>
    %9 = arith.mulf %1, %8 : vector<4x64xf32>
    %10 = arith.truncf %9 : vector<4x64xf32> to vector<4x64xbf16>
    %cst_4 = arith.constant dense<0.000000e+00> : vector<4x256xf32>
    %11 = tpu.matmul %10, %0, %cst_4 {dimension_numbers = #tpu.dot_dimension_numbers<[1], [0], [0], [1], [0, 0, 1, 1], [], []>} : vector<4x64xbf16>, vector<64x256xbf16>, vector<4x256xf32> -> vector<4x256xf32>
    %12 = math.exp %11 : vector<4x256xf32>
    %cst_5 = arith.constant dense<0.000000e+00> : vector<256xf32>
    %13 = vector.multi_reduction <add>, %12, %cst_5 [0] : vector<4x256xf32> to vector<256xf32>
    %14 = vector.shape_cast %13 : vector<256xf32> to vector<1x256xf32>
    %15 = vector.broadcast %14 : vector<1x256xf32> to vector<4x256xf32>
    %16 = arith.divf %12, %15 : vector<4x256xf32>
    %c0_6 = arith.constant 0 : index
    %c0_7 = arith.constant 0 : index
    %17 = vector.load %arg1[%c0_6, %c0_7] : memref<64x256xf32, #tpu.memory_space<vmem>>, vector<64x256xf32>
    %18 = vector.shape_cast %17 : vector<64x256xf32> to vector<1x64x256xf32>
    %19 = vector.shape_cast %16 : vector<4x256xf32> to vector<4x1x256xf32>
    %20 = vector.broadcast %18 : vector<1x64x256xf32> to vector<4x64x256xf32>
    %21 = vector.broadcast %19 : vector<4x1x256xf32> to vector<4x64x256xf32>
    %22 = arith.mulf %20, %21 : vector<4x64x256xf32>
    %23 = vector.shape_cast %22 : vector<4x64x256xf32> to vector<256x256xf32>
    %24 = arith.mulf %23, %23 : vector<256x256xf32>
    %cst_8 = arith.constant dense<0.000000e+00> : vector<256xf32>
    %25 = vector.multi_reduction <add>, %24, %cst_8 [1] : vector<256x256xf32> to vector<256xf32>
    %26 = vector.shape_cast %25 : vector<256xf32> to vector<256x1xf32>
    %cst_9 = arith.constant 1.000000e-24 : f32
    %27 = vector.broadcast %cst_9 : f32 to vector<256x1xf32>
    %28 = arith.maximumf %26, %27 : vector<256x1xf32>
    %29 = math.rsqrt %28 : vector<256x1xf32>
    %30 = vector.broadcast %29 : vector<256x1xf32> to vector<256x256xf32>
    %31 = arith.mulf %23, %30 : vector<256x256xf32>
    %32 = arith.truncf %31 : vector<256x256xf32> to vector<256x256xbf16>
    %c0_10 = arith.constant 0 : index
    %c0_11 = arith.constant 0 : index
    %33 = vector.load %arg4[%c0_10, %c0_11] : memref<256x64xbf16, #tpu.memory_space<vmem>>, vector<256x64xbf16>
    %cst_12 = arith.constant dense<0.000000e+00> : vector<256x64xf32>
    %34 = tpu.matmul %32, %33, %cst_12 {dimension_numbers = #tpu.dot_dimension_numbers<[1], [0], [0], [1], [0, 0, 1, 1], [], []>} : vector<256x256xbf16>, vector<256x64xbf16>, vector<256x64xf32> -> vector<256x64xf32>
    %c0_13 = arith.constant 0 : index
    %c0_14 = arith.constant 0 : index
    %35 = vector.load %arg5[%c0_13, %c0_14] : memref<1x64xf32, #tpu.memory_space<vmem>>, vector<1x64xf32>
    %36 = vector.broadcast %35 : vector<1x64xf32> to vector<256x64xf32>
    %37 = arith.addf %34, %36 : vector<256x64xf32>
    %38 = math.tanh %37 : vector<256x64xf32>
    %39 = arith.truncf %38 : vector<256x64xf32> to vector<256x64xbf16>
    %c0_15 = arith.constant 0 : index
    %c0_16 = arith.constant 0 : index
    %40 = vector.load %arg6[%c0_15, %c0_16] : memref<64x64xbf16, #tpu.memory_space<vmem>>, vector<64x64xbf16>
    %cst_17 = arith.constant dense<0.000000e+00> : vector<256x64xf32>
    %41 = tpu.matmul %39, %40, %cst_17 {dimension_numbers = #tpu.dot_dimension_numbers<[1], [0], [0], [1], [0, 0, 1, 1], [], []>} : vector<256x64xbf16>, vector<64x64xbf16>, vector<256x64xf32> -> vector<256x64xf32>
    %c0_18 = arith.constant 0 : index
    %c0_19 = arith.constant 0 : index
    %42 = vector.load %arg7[%c0_18, %c0_19] : memref<1x64xf32, #tpu.memory_space<vmem>>, vector<1x64xf32>
    %43 = vector.broadcast %42 : vector<1x64xf32> to vector<256x64xf32>
    %44 = arith.addf %41, %43 : vector<256x64xf32>
    %45 = tpu.iota {dimensions = array<i32: 1>} : vector<256x64xi32>
    %c32_i32 = arith.constant 32 : i32
    %46 = vector.broadcast %c32_i32 : i32 to vector<256x64xi32>
    %47 = arith.cmpi slt, %45, %46 : vector<256x64xi32>
    %48 = arith.mulf %44, %44 : vector<256x64xf32>
    %cst_20 = arith.constant 0.000000e+00 : f32
    %49 = vector.broadcast %cst_20 : f32 to vector<256x64xf32>
    %50 = arith.select %47, %48, %49 : vector<256x64xi1>, vector<256x64xf32>
    %cst_21 = arith.constant dense<0.000000e+00> : vector<256xf32>
    %51 = vector.multi_reduction <add>, %50, %cst_21 [1] : vector<256x64xf32> to vector<256xf32>
    %52 = vector.shape_cast %51 : vector<256xf32> to vector<256x1xf32>
    %cst_22 = arith.constant 1.000000e-24 : f32
    %53 = vector.broadcast %cst_22 : f32 to vector<256x1xf32>
    %54 = arith.maximumf %52, %53 : vector<256x1xf32>
    %55 = math.rsqrt %54 : vector<256x1xf32>
    %56 = vector.broadcast %55 : vector<256x1xf32> to vector<256x64xf32>
    %57 = arith.mulf %44, %56 : vector<256x64xf32>
    %cst_23 = arith.constant 0.000000e+00 : f32
    %58 = vector.broadcast %cst_23 : f32 to vector<256x64xf32>
    %59 = arith.subf %58, %44 : vector<256x64xf32>
    %60 = arith.select %47, %57, %59 : vector<256x64xi1>, vector<256x64xf32>
    %c0_24 = arith.constant 0 : index
    %c0_25 = arith.constant 0 : index
    %61 = vector.load %arg9[%c0_24, %c0_25] : memref<256x64xf32, #tpu.memory_space<vmem>>, vector<256x64xf32>
    tpu.vector_store %arg9[%c0_24, %c0_25], %60 {strides = array<i32>} : memref<256x64xf32, #tpu.memory_space<vmem>>, vector<256x64xf32>,
    %cst_26 = arith.constant 0.000000e+00 : f32
    %62 = vector.broadcast %cst_26 : f32 to vector<256x64xf32>
    %63 = arith.select %47, %60, %62 : vector<256x64xi1>, vector<256x64xf32>
    %64 = arith.truncf %63 : vector<256x64xf32> to vector<256x64xbf16>
    %cst_27 = arith.constant dense<0.000000e+00> : vector<256x256xf32>
    %65 = tpu.matmul %64, %0, %cst_27 {dimension_numbers = #tpu.dot_dimension_numbers<[1], [0], [0], [1], [0, 0, 1, 1], [], []>} : vector<256x64xbf16>, vector<64x256xbf16>, vector<256x256xf32> -> vector<256x256xf32>
    %66 = math.exp %65 : vector<256x256xf32>
    %67 = vector.shape_cast %66 : vector<256x256xf32> to vector<4x64x256xf32>
    %68 = vector.shape_cast %16 : vector<4x256xf32> to vector<4x1x256xf32>
    %69 = vector.broadcast %68 : vector<4x1x256xf32> to vector<4x64x256xf32>
    %70 = arith.mulf %67, %69 : vector<4x64x256xf32>
    %cst_28 = arith.constant dense<0.000000e+00> : vector<64x256xf32>
    %71 = vector.multi_reduction <add>, %70, %cst_28 [0] : vector<4x64x256xf32> to vector<64x256xf32>
    %72 = math.log %71 : vector<64x256xf32>
    %c0_29 = arith.constant 0 : index
    %c0_30 = arith.constant 0 : index
    %73 = vector.load %arg8[%c0_29, %c0_30] : memref<64x256xf32, #tpu.memory_space<vmem>>, vector<64x256xf32>
    tpu.vector_store %arg8[%c0_29, %c0_30], %72 {strides = array<i32>} : memref<64x256xf32, #tpu.memory_space<vmem>>, vector<64x256xf32>,
    return
  }
  func.func @transform_0(%arg0: i32) -> (i32, i32) {
    %c0_i32 = arith.constant 0 : i32
    %c0_i32_0 = arith.constant 0 : i32
    return %arg0, %c0_i32 : i32, i32
  }
  func.func @transform_1(%arg0: i32) -> (i32, i32) {
    %c0_i32 = arith.constant 0 : i32
    %c0_i32_0 = arith.constant 0 : i32
    %c0_i32_1 = arith.constant 0 : i32
    return %c0_i32, %c0_i32_0 : i32, i32
  }
  func.func @transform_2(%arg0: i32) -> (i32, i32) {
    %c0_i32 = arith.constant 0 : i32
    %c0_i32_0 = arith.constant 0 : i32
    %c0_i32_1 = arith.constant 0 : i32
    return %c0_i32, %c0_i32_0 : i32, i32
  }
  func.func @transform_3(%arg0: i32) -> (i32, i32) {
    %c0_i32 = arith.constant 0 : i32
    %c0_i32_0 = arith.constant 0 : i32
    %c0_i32_1 = arith.constant 0 : i32
    return %c0_i32, %c0_i32_0 : i32, i32
  }
  func.func @transform_4(%arg0: i32) -> (i32, i32) {
    %c0_i32 = arith.constant 0 : i32
    %c0_i32_0 = arith.constant 0 : i32
    %c0_i32_1 = arith.constant 0 : i32
    return %c0_i32, %c0_i32_0 : i32, i32
  }
  func.func @transform_5(%arg0: i32) -> (i32, i32) {
    %c0_i32 = arith.constant 0 : i32
    %c0_i32_0 = arith.constant 0 : i32
    %c0_i32_1 = arith.constant 0 : i32
    return %c0_i32, %c0_i32_0 : i32, i32
  }
  func.func @transform_6(%arg0: i32) -> (i32, i32) {
    %c0_i32 = arith.constant 0 : i32
    %c0_i32_0 = arith.constant 0 : i32
    %c0_i32_1 = arith.constant 0 : i32
    return %c0_i32, %c0_i32_0 : i32, i32
  }
  func.func @transform_7(%arg0: i32) -> (i32, i32) {
    %c0_i32 = arith.constant 0 : i32
    %c0_i32_0 = arith.constant 0 : i32
    return %arg0, %c0_i32 : i32, i32
  }
  func.func @transform_8(%arg0: i32) -> (i32, i32) {
    %c0_i32 = arith.constant 0 : i32
    %c0_i32_0 = arith.constant 0 : i32
    return %arg0, %c0_i32 : i32, i32
  }
}

</mosaic_0001>

<bundles_post_ra>
// kernel: tpu_custom_call.1
= control target key start
LH: loop header
LB: loop body
LE: loop exit
PB: predicated region body
PF: predicated region fallthrough
CT: control target
= control target key end

     0   :  { %14 = vsyncpa [#allocation3], 0  ;;  %s5145_s0 = inlined_call_operand.hbm [shape: f32[256,256], index: 0, kind: input, shape index: {}]   ;;  %s5146_s1 = inlined_call_operand.vmem [shape: bf16[64,256], index: 1, kind: input, shape index: {}]   ;;  %s5147_s2 = inlined_call_operand.vmem [shape: f32[4,64], index: 2, kind: input, shape index: {}]   ;;  %s5148_s3 = inlined_call_operand.vmem [shape: bf16[256,64], index: 3, kind: input, shape index: {}]   ;;  %s5149_s4 = inlined_call_operand.vmem [shape: f32[1,64], index: 4, kind: input, shape index: {}]   ;;  %s5150_s5 = inlined_call_operand.vmem [shape: bf16[64,64], index: 5, kind: input, shape index: {}]   ;;  %s5151_s6 = inlined_call_operand.vmem [shape: f32[1,64], index: 6, kind: input, shape index: {}]   ;;  %s5152_s7 = inlined_call_operand.hbm [shape: f32[256,256], index: 7, kind: output, shape index: {0}]   ;;  %s5153_s8 = inlined_call_operand.vmem [shape: f32[1024,64], index: 8, kind: output, shape index: {1}]  }
   0x1   :  { %16 = vsyncpa [#allocation3 + $0x1], 0 }
   0x2   :  { %17 = vsyncpa [#allocation4], 0 }
   0x3   :  { %19 = vsyncpa [#allocation4 + $0x1], 0  ;;  %s3447_s27 = smov 0   ;;  %s3449_s28 = smov 0  }
   0x4   :  { %s3451_s29 = smov 0   ;;  %s3453_s30 = smov 0  }
   0x5 LB: > { %s3468_s9 = sadd.s32 4294967295, %s3392_s30   ;;  %s2581_s10 = sadd.s32 4294967294, %s3392_s30   ;;  %s3392_s30 = sphi %s3453_s30, %s5260_s30   ;;  %s3388_s29 = sphi %s3451_s29, %s5259_s29   ;;  %s3384_s28 = sphi %s3449_s28, %s5258_s28   ;;  %s3380_s27 = sphi %s3447_s27, %s5257_s27  }
   0x6   : > { %s3472_s11 = sadd.s32 1, %s3392_s30   ;;  %s32_s12 = sadd.s32 1, %s3388_s29 }
   0x7   : > { %s29_s13 = ssub.s32 %s3392_s30, %s3472_s11  ;;  %p39_p0 = scmp.ne.s32.totalorder %s3388_s29, %s3384_s28 }
   0x8   : > { %p30_p1 = scmp.eq.s32.totalorder %s29_s13, 0  ;;  %p40_p2 = scmp.eq.s32.totalorder %s3392_s30, 0 }
   0x9   : > { %p45_p3 = scmp.ne.s32.totalorder %s3384_s28, %s3380_s27  ;;  %p46_p4 = scmp.eq.s32.totalorder %s3468_s9, 0 }
   0xa   : > { %s3484_s14 = scalar_select %p30_p1, %s3388_s29, %s32_s12  }
   0xb   : > { %p3486_p5 = por %p40_p2, %p39_p0  ;;  %p3490_p6 = por %p46_p4, %p45_p3 }
   0xc   : > { %5193 = sst [smem:[#allocation8_spill]] %s3484_s14  ;;  %p195_p7 = scmp.eq.s32.totalorder %s3468_s9, 3 }
   0xd   : > { %s5195_s16 = scalar_select %p3490_p6, 1, 0 }
   0xe   : > { %p201_p8 = scmp.eq.s32.totalorder %s2581_s10, 3  ;;  %p2858_p9 = scmp.lt.s32.totalorder %s3392_s30, 4 }
   0xf   : > { %p3496_p10 = por %p195_p7, %p39_p0  ;;  %s265_s19 = sand.u32 1, %s3388_s29  }
  0x10   : > { %p3500_p11 = por %p201_p8, %p45_p3  ;;  %s2663_s20 = sshll.u32 %s3392_s30, 11 }
  0x11   : > { %s5196_s17 = scalar_select %p3496_p10, 1, 0 }
  0x12   : > { %s5197_s18 = scalar_select %p3500_p11, 1, 0 }
  0x13   : > { %s2584_s21 = sshll.u32 %s265_s19, 7  ;;  %s3509_s24 = scalar_lea.hbm %s5145_s0, %s2663_s20 }
  0x14   : > { %s269_s25 = scalar_lea.vmem [#allocation2], %s2584_s21  ;;  %p3513_p12 = pnand %p2858_p9, %p3486_p5 }
  0x15   : > { %s277_s26 = sshll.u32 %s269_s25, 4  ;;  %s3519_s12 = scalar_lea.sflag [#allocation3], %s265_s19  ;;  %s3517_s26 = int_to_ptr.vmem [resolvable:$true] %s277_s26 }
  0x16   : > { %s3300_s13 = scalar_lea.hbm %s3509_s24, 2048  ;;  %p3302_p0 = pneg %p3513_p12 }
  0x17   : > { %p3301_p13 = scmp.ne.s32.totalorder %s3509_s24, %s3300_s13  ;;  %s3305_s21 = scalar_lea.hbm %s5145_s0, 8192 }
  0x18   : > { %p3306_p3 = scmp.lt.s32.totalorder %s3509_s24, %s5145_s0  ;;  %p3307_p4 = scmp.lt.s32.totalorder %s3305_s21, %s3300_s13 }
  0x19   : > { %p3303_p1 = pnand %p3302_p0, %p3301_p13 }
  0x1a   : > { %p3308_p5 = por %p3307_p4, %p3306_p3 }
  0x1b   : > { %p3304_p2 = pneg %p3303_p1 }
  0x1d   : > { %p3309_p7 = pnand %p3308_p5, %p3304_p2 }
  0x1f   : > { %3312 = shalt.err (!%p3309_p7)
}
  0x20   : > { %s3313_s19 = scalar_lea.vmem %s3517_s26, 2048  ;;  %s3394_s25 = smov [#allocation2]  }
  0x21   : > { %p3314_p8 = scmp.ne.s32.totalorder %s3517_s26, %s3313_s19  ;;  %s3318_s14 = sshll.u32 %s3394_s25, 4  ;;  %s3319_s14 = int_to_ptr.vmem [resolvable:$false] %s3318_s14 }
  0x22   : > { %s3320_s20 = scalar_lea.vmem %s3319_s14, 4096  ;;  %p3321_p1 = scmp.lt.s32.totalorder %s3517_s26, %s3319_s14 }
  0x23   : > { %p3316_p9 = pnand %p3314_p8, %p3302_p0  ;;  %p3322_p11 = scmp.lt.s32.totalorder %s3320_s20, %s3313_s19 }
  0x25   : > { %p3317_p13 = pneg %p3316_p9  ;;  %p3323_p10 = por %p3322_p11, %p3321_p1 }
  0x27   : > { %p3324_p6 = pnand %p3323_p10, %p3317_p13 }
  0x29   : > { %3327 = shalt.err (!%p3324_p6)
}
  0x2a   : > { %s3395_s13 = smov 256   ;;  %s3396_s22 = smov 16  }
  0x2b   : > { %2853 = dma.hbm_to_vmem [thread:$0]  (!%p3513_p12), %s3509_s24, 2048, %s3517_s26, %s3519_s12, %s3395_s13, %s3395_s13, %s3396_s22  }
  0x2c   : > { %p2588_p0 = scmp.ge.s32.totalorder %s3392_s30, 1  ;;  %p285_p2 = scmp.lt.s32.totalorder %s3392_s30, 5 }
  0x2e   : > { %p286_p3 = pnand %p2588_p0, %p285_p2 }
  0x30   : > { %289 = sbr.rel (%p286_p3) target bundleno = 1594 (0x63a), region = 48 }
  0x35   : > { %s3543_s14 = sand.u32 1, %s3384_s28   ;;  %p5199_p6 = scmp.ne.s32.totalorder %s5195_s16, 0 }
  0x36   : > { %s2589_s21 = sshll.u32 %s3543_s14, 7  ;;  %s292_s15 = scalar_lea.sflag [#allocation3], %s3543_s14 }
  0x37   : > { %s3549_s23 = scalar_lea.vmem [#allocation2], %s2589_s21 }
  0x38   : > { %3371 = dma.done.wait (%p5199_p6), %s292_s15, 2048  }
  0x39   : > { %3373 = vsyncadd (%p5199_p6), %s292_s15, 4294965248  ;;  %v350_v0 = vld [vmem:[%s5147_s2] sm:$0xf]  ;;  %vm352_vm0 = vcmask 519168   ;;  %v2898_v3 = vld [vmem:[%s5146_s1 + $0x34] ss:$8 sps:$4 sm:$0xff]   ;;  %v5156_v47 = vlaneseq }
  0x3a   : > { %v351_v1 = vmul.f32 %v350_v0, %v350_v0  ;;  %v2900_v4 = vld [vmem:[%s5146_s1 + $0x30] ss:$8 sps:$4 sm:$0xff]   ;;  %v2901_v5 = vld [vmem:[%s5146_s1 + $0x24] ss:$8 sps:$4 sm:$0xff]   ;;  %412 = vmatprep.subr.bf16.mxu0 %v2898_v3  ;;  %v2903_v6 = vld [vmem:[%s5146_s1 + $0x20] ss:$8 sps:$4 sm:$0xff]  }
  0x3b   : > { %413 = vmatpush1.bf16.msra.mxu0 %v2900_v4  ;;  %v5157_v7 = vmov 0   ;;  %v2904_v8 = vld [vmem:[%s5146_s1 + $0x14] ss:$8 sps:$4 sm:$0xff]   ;;  %v2906_v9 = vld [vmem:[%s5146_s1 + $0x10] ss:$8 sps:$4 sm:$0xff]   ;;  %vm400_vm1 = vcmask 523264  }
  0x3c   : > { %v353_v2 = vsel %vm352_vm0, %v351_v1, 0.0  ;;  %436 = vmatprep.mubr.bf16.mxu0 %v5157_v7  ;;  %414 = vmatprep.subr.bf16.mxu0 %v2901_v5  ;;  %v2907_v10 = vld [vmem:[%s5146_s1 + $0x4] ss:$8 sps:$4 sm:$0xff]   ;;  %v2909_v11 = vld [vmem:[%s5146_s1] ss:$8 sps:$4 sm:$0xff]   ;;  %v2910_v17 = vld [vmem:[%s5148_s3 + $0x78] sm:$0xff]  }
  0x3d   : > { %354 = vadd.xlane.f32.xlu0 %v353_v2  ;;  %v2911_v18 = vld [vmem:[%s5148_s3 + $0x38] sm:$0xff]   ;;  %v2912_v19 = vld [vmem:[%s5148_s3 + $0x70] sm:$0xff]   ;;  %2666 = vmatprep.subr.bf16.mxu1 %v2910_v17  ;;  %v2914_v22 = vld [vmem:[%s5148_s3 + $0x68] sm:$0xff]   ;;  %vm449_vm2 = vcmask 1043456   ;;  %v3398_v45 = vmov 1966171168  }
  0x3e   : > { %2667 = vmatpush3.bf16.msra.mxu1 %v2911_v18  ;;  %v2913_v20 = vld [vmem:[%s5148_s3 + $0x30] sm:$0xff]   ;;  %v2915_v26 = vld [vmem:[%s5148_s3 + $0x28] sm:$0xff]   ;;  %v488_v46 = vunpack.c.l.s4 %v3398_v45  ;;  %v491_v49 = vshrl.u32 %v5156_v47, 7  ;;  %v3624_v1 = vld [vmem:[%s3549_s23] sm:$0xff]  ;;  %s5060_s26 = scalar_lea.vmem [#allocation5], %s2589_s21  ;;  %s2665_s21 = sshll.u32 %s3468_s9, 11 }
  0x3f   : > { %415 = vmatpush1.bf16.msra.mxu0 %v2903_v6  ;;  %2668 = vmatprep.subr.bf16.mxu1 %v2912_v19  ;;  %v3618_v63 = vld [vmem:[%s3549_s23 + $0x10] sm:$0xff]  ;;  %v3627_v2 = vld [vmem:[%s3549_s23 + $0x8] sm:$0xff]  ;;  %v3630_v3 = vld [vmem:[%s3549_s23 + $0x20] sm:$0xff]  ;;  %s2479_s10 = sshll.u32 %s5060_s26, 4  ;;  %s5099_s25 = scalar_lea.hbm %s5152_s7, %s2665_s21  ;;  %s5101_s10 = int_to_ptr.vmem [resolvable:$true] %s2479_s10 }
  0x40   : > { %416 = vmatprep.subr.bf16.mxu0 %v2904_v8  ;;  %v489_v48 = vunpack.c.0.s8 %v488_v46  ;;  %v3603_v57 = vsub.s32 0, %v491_v49  ;;  %v3605_v58 = vsub.s32 1, %v491_v49  ;;  %v3633_v4 = vld [vmem:[%s3549_s23 + $0x28] sm:$0xff]  ;;  %s2460_s20 = scalar_lea.sflag [#allocation4], %s3543_s14  ;;  %p5254_p12 = scmp.ne.s32.totalorder %s5196_s17, 0 }
  0x41   : > { %s3399_s13 = smov [#allocation5]  }
  0x42   : > { %2669 = vmatpush3.bf16.msra.mxu1 %v2913_v20  ;;  %v492_v54 = vsub.s32 %v489_v48, %v491_v49  ;;  %v3680_v20 = vld [vmem:[%s3549_s23 + $0x50] sm:$0xff] }
  0x43   : > { %417 = vmatpush1.bf16.msra.mxu0 %v2906_v9  ;;  %2670 = vmatprep.subr.bf16.mxu1 %v2914_v22  ;;  %v3648_v9 = vld [vmem:[%s3549_s23 + $0x30] sm:$0xff] }
  0x44   : > { %418 = vmatprep.subr.bf16.mxu0 %v2907_v10  ;;  %v3651_v10 = vld [vmem:[%s3549_s23 + $0x38] sm:$0xff] }
  0x46   : > { %2671 = vmatpush3.bf16.msra.mxu1 %v2915_v26 }
  0x47   : > { %419 = vmatpush1.bf16.msra.mxu0 %v2909_v11 }
  0xc6   : > { %v355_v12 = vpop.xlane.xlu0 %354 }
  0xc7   : > { %v356_v13 = vmax.f32 %v355_v12, 1e-24 }
  0xc9   : > { %2930 = vrsqrt.f32 %v356_v13 }
  0xd6   : > { %v2931_v14 = vpop.eup %2930 }
  0xd7   : > { %v358_v15 = vmul.f32 %v2931_v14, %v350_v0  ;;  %v3621_v0 = vld [vmem:[%s3549_s23 + $0x18] sm:$0xff]  ;;  %v3664_v14 = vld [vmem:[%s3549_s23 + $0x40] sm:$0xff] }
  0xd9   : > { %v359_v16 = vpack.c.bf16 %v358_v15, %v358_v15  ;;  %v3667_v15 = vld [vmem:[%s3549_s23 + $0x48] sm:$0xff] }
  0xdb   : > { %2601 = vmatmul.mubr.msk.bf16.vlgmr.msra.gmra.mxu0 %vm400_vm1, %v359_v16 }
 0x19b   : > { %v438_v21 = vpop.f32.mrf.mxu0 }
 0x19c   : > { %v445_v23 = vmul.f32 1.442695, %v438_v21 }
 0x19d   : > { %v440_v24 = vpop.f32.mrf.mxu0 }
 0x19e   : > { %2932 = vpow2.f32 %v445_v23  ;;  %v447_v25 = vmul.f32 1.442695, %v440_v24 }
 0x19f   : > { %v442_v27 = vpop.f32.mrf.mxu0 }
 0x1a0   : > { %2934 = vpow2.f32 %v447_v25  ;;  %v3695_v25 = vld [vmem:[%s3549_s23 + $0x58] sm:$0xff] }
 0x1a1   : > { %v443_v28 = vpop.f32.mrf.mxu0 }
 0x1ab   : > { %v2933_v29 = vpop.eup %2932 }
 0x1ac   : > { %v450_v30 = vsel %vm449_vm2, %v2933_v29, 0.0 }
 0x1ad   : > { %v2935_v31 = vpop.eup %2934  ;;  %v451_v32 = vrot.slane %v450_v30, 4 }
 0x1ae   : > { %v457_v33 = vsel %vm449_vm2, %v2935_v31, 0.0 }
 0x1af   : > { %v452_v34 = vadd.f32 %v451_v32, %v450_v30  ;;  %v458_v35 = vrot.slane %v457_v33, 4 }
 0x1b1   : > { %v453_v36 = vrot.slane %v452_v34, 2  ;;  %v459_v37 = vadd.f32 %v458_v35, %v457_v33  ;;  %v3719_v35 = vld [vmem:[%s3549_s23 + $0x68] sm:$0xff] }
 0x1b3   : > { %v454_v38 = vadd.f32 %v453_v36, %v452_v34  ;;  %v460_v39 = vrot.slane %v459_v37, 2  ;;  %v3716_v34 = vld [vmem:[%s3549_s23 + $0x60] sm:$0xff] }
 0x1b5   : > { %v455_v40 = vrot.slane %v454_v38, 1  ;;  %v461_v41 = vadd.f32 %v460_v39, %v459_v37  ;;  %v3726_v37 = vld [vmem:[%s3549_s23 + $0x70] sm:$0xff] }
 0x1b7   : > { %v456_v42 = vadd.f32 %v455_v40, %v454_v38  ;;  %v462_v43 = vrot.slane %v461_v41, 1  ;;  %v3729_v38 = vld [vmem:[%s3549_s23 + $0x78] sm:$0xff]  ;;  %s2591_s23 = sshll.u32 %s3468_s9, 5  ;;  %s3328_s9 = scalar_lea.vmem %s5101_s10, 2048 }
 0x1b8   : > { %p336_p10 = scmp.lt.s32.totalorder %s2591_s23, 127  ;;  %p3329_p11 = scmp.ne.s32.totalorder %s5101_s10, %s3328_s9 }
 0x1b9   : > { %2936 = vrcp.f32 %v456_v42  ;;  %v463_v44 = vadd.f32 %v462_v43, %v461_v41 }
 0x1ba   : > { %s5262_s23 = smov (!%p336_p10, %s2591_s23), 127  ;;  %p3330_p4 = pnand %p3329_p11, %p5254_p12 }
 0x1bb   : > { %2938 = vrcp.f32 %v463_v44  ;;  %s2592_s16 = sshll.u32 %s5262_s23, 3  ;;  %s3332_s23 = sshll.u32 %s3399_s13, 4  ;;  %s3333_s23 = int_to_ptr.vmem [resolvable:$false] %s3332_s23 }
 0x1bc   : > { %s4529_s24 = scalar_lea.vmem %s5153_s8, %s2592_s16  ;;  %p3331_p5 = pneg %p3330_p4 }
 0x1bd   : > { %s3334_s16 = scalar_lea.vmem %s3333_s23, 4096  ;;  %p3335_p7 = scmp.lt.s32.totalorder %s5101_s10, %s3333_s23 }
 0x1be   : > { %p3336_p8 = scmp.lt.s32.totalorder %s3334_s16, %s3328_s9 }
 0x1c0   : > { %p3337_p9 = por %p3336_p8, %p3335_p7 }
 0x1c2   : > { %p3338_p13 = pnand %p3337_p9, %p3331_p5 }
 0x1c6   : > { %v2937_v50 = vpop.eup %2936 }
 0x1c7   : > { %v465_v52 = vmul.f32 %v2937_v50, %v2933_v29 }
 0x1c8   : > { %v2939_v51 = vpop.eup %2938 }
 0x1c9   : > { %v467_v53 = vmul.f32 %v2939_v51, %v2935_v31 }
 0x1cb   : > { %v486_v55 = vcombine.low %v465_v52, %v467_v53 }
 0x1cd   : > { %v493_v56 = vrot.slane %v486_v55, %v492_v54 }
 0x1cf   : > { %v3607_v59 = vrot.slane %v493_v56, %v492_v54  ;;  %v494_v60 = vcombine.high %v493_v56, %v493_v56 }
 0x1d1   : > { %v3611_v61 = vrot.slane %v3607_v59, %v3603_v57  ;;  %v3615_v62 = vrot.slane %v3607_v59, %v3605_v58  ;;  %v3653_v11 = vrot.slane %v494_v60, %v492_v54 }
 0x1d3   : > { %5200 = vst [vmem:[#allocation9_spill] sm:$0xff] %v3611_v61  ;;  %5201 = vst [vmem:[#allocation10_spill] sm:$0xff] %v3615_v62  ;;  %v3637_v5 = vmul.f32 %v3611_v61, %v3618_v63  ;;  %v3641_v6 = vmul.f32 %v3615_v62, %v3621_v0  ;;  %v3645_v8 = vmul.f32 %v3611_v61, %v3624_v1 }
 0x1d4   : > { %v3657_v12 = vmul.f32 %v3615_v62, %v3627_v2  ;;  %v3661_v13 = vmul.f32 %v3611_v61, %v3630_v3  ;;  %v3677_v19 = vmul.f32 %v3615_v62, %v3633_v4  ;;  %v3688_v23 = vmul.f32 %v3611_v61, %v3648_v9 }
 0x1d5   : > { %v617_v16 = vmul.f32 %v3637_v5, %v3637_v5  ;;  %v618_v17 = vmul.f32 %v3641_v6, %v3641_v6  ;;  %v615_v18 = vmul.f32 %v3645_v8, %v3645_v8  ;;  %v3692_v24 = vmul.f32 %v3615_v62, %v3651_v10 }
 0x1d6   : > { %v616_v21 = vmul.f32 %v3657_v12, %v3657_v12  ;;  %v619_v22 = vmul.f32 %v3661_v13, %v3661_v13  ;;  %v620_v27 = vmul.f32 %v3677_v19, %v3677_v19  ;;  %v3701_v28 = vmul.f32 %v3611_v61, %v3664_v14 }
 0x1d7   : > { %v682_v26 = vadd.f32 %v618_v17, %v617_v16  ;;  %v3705_v29 = vmul.f32 %v3615_v62, %v3667_v15  ;;  %v621_v31 = vmul.f32 %v3688_v23, %v3688_v23  ;;  %v622_v32 = vmul.f32 %v3692_v24, %v3692_v24 }
 0x1d8   : > { %v679_v30 = vadd.f32 %v616_v21, %v615_v18  ;;  %v3713_v33 = vmul.f32 %v3611_v61, %v3680_v20  ;;  %v3723_v36 = vmul.f32 %v3615_v62, %v3695_v25  ;;  %v3733_v39 = vrot.slane %v3653_v11, %v3603_v57 }
 0x1d9   : > { %683 = vadd.xlane.f32.xlu1 %v682_v26  ;;  %v3737_v40 = vrot.slane %v3653_v11, %v3605_v58  ;;  %v685_v41 = vadd.f32 %v620_v27, %v619_v22  ;;  %v623_v42 = vmul.f32 %v3701_v28, %v3701_v28  ;;  %v688_v43 = vadd.f32 %v622_v32, %v621_v31 }
 0x1da   : > { %5202 = vst [vmem:[#allocation11_spill] sm:$0xff] %v3733_v39  ;;  %680 = vadd.xlane.f32.xlu0 %v679_v30  ;;  %v624_v44 = vmul.f32 %v3705_v29, %v3705_v29  ;;  %v3745_v45 = vmul.f32 %v3611_v61, %v3716_v34  ;;  %v3749_v46 = vmul.f32 %v3615_v62, %v3719_v35 }
 0x1db   : > { %5203 = vst [vmem:[#allocation12_spill] sm:$0xff] %v3737_v40  ;;  %v625_v48 = vmul.f32 %v3713_v33, %v3713_v33  ;;  %v626_v49 = vmul.f32 %v3723_v36, %v3723_v36  ;;  %v3757_v50 = vmul.f32 %v3611_v61, %v3726_v37  ;;  %v3761_v51 = vmul.f32 %v3615_v62, %v3729_v38 }
 0x1dc   : > { %v3765_v52 = vmul.f32 %v3733_v39, %v3618_v63  ;;  %v3769_v53 = vmul.f32 %v3737_v40, %v3621_v0  ;;  %v3773_v54 = vmul.f32 %v3733_v39, %v3624_v1  ;;  %v3777_v55 = vmul.f32 %v3737_v40, %v3627_v2 }
 0x1dd   : > { %686 = vadd.xlane.f32.xlu1 %v685_v41  ;;  %v691_v56 = vadd.f32 %v624_v44, %v623_v42  ;;  %v627_v60 = vmul.f32 %v3745_v45, %v3745_v45  ;;  %v628_v16 = vmul.f32 %v3749_v46, %v3749_v46  ;;  %v694_v17 = vadd.f32 %v626_v49, %v625_v48 }
 0x1de   : > { %689 = vadd.xlane.f32.xlu0 %v688_v43  ;;  %v629_v18 = vmul.f32 %v3757_v50, %v3757_v50  ;;  %v630_v21 = vmul.f32 %v3761_v51, %v3761_v51  ;;  %v633_v22 = vmul.f32 %v3765_v52, %v3765_v52  ;;  %v634_v26 = vmul.f32 %v3769_v53, %v3769_v53 }
 0x1df   : > { %v631_v27 = vmul.f32 %v3773_v54, %v3773_v54  ;;  %v632_v30 = vmul.f32 %v3777_v55, %v3777_v55  ;;  %v697_v31 = vadd.f32 %v628_v16, %v627_v60  ;;  %v3797_v32 = vmul.f32 %v3733_v39, %v3630_v3  ;;  %v2916_v60 = vld [vmem:[%s5148_s3 + $0x60] sm:$0xff]  }
 0x1e0   : > { %v3801_v41 = vmul.f32 %v3737_v40, %v3633_v4  ;;  %v700_v42 = vadd.f32 %v630_v21, %v629_v18  ;;  %v3805_v43 = vmul.f32 %v3733_v39, %v3648_v9  ;;  %v3809_v44 = vmul.f32 %v3737_v40, %v3651_v10  ;;  %v2917_v21 = vld [vmem:[%s5148_s3 + $0x20] sm:$0xff]   ;;  %2672 = vmatprep.subr.bf16.mxu1 %v2916_v60 }
 0x1e1   : > { %692 = vadd.xlane.f32.xlu1 %v691_v56  ;;  %5204 = vst [vmem:[#allocation13_spill] sm:$0xff] %v3797_v32  ;;  %v509_v48 = vcombine.high %v3607_v59, %v3607_v59  ;;  %v706_v49 = vadd.f32 %v634_v26, %v633_v22  ;;  %v703_v56 = vadd.f32 %v632_v30, %v631_v27 }
 0x1e2   : > { %695 = vadd.xlane.f32.xlu0 %v694_v17  ;;  %5205 = vst [vmem:[#allocation14_spill] sm:$0xff] %v3805_v43  ;;  %v635_v16 = vmul.f32 %v3797_v32, %v3797_v32  ;;  %v636_v17 = vmul.f32 %v3801_v41, %v3801_v41  ;;  %v3822_v18 = vmul.f32 %v3733_v39, %v3664_v14 }
 0x1e3   : > { %v3826_v59 = vmul.f32 %v3737_v40, %v3667_v15  ;;  %v637_v22 = vmul.f32 %v3805_v43, %v3805_v43  ;;  %v638_v26 = vmul.f32 %v3809_v44, %v3809_v44  ;;  %v3837_v27 = vmul.f32 %v3733_v39, %v3680_v20  ;;  %2673 = vmatpush3.bf16.msra.mxu1 %v2917_v21 }
 0x1e4   : > { %5206 = vst [vmem:[#allocation15_spill] sm:$0xff] %v3822_v18  ;;  %v3841_v30 = vmul.f32 %v3737_v40, %v3695_v25  ;;  %v3852_v47 = vmul.f32 %v3737_v40, %v3729_v38  ;;  %v3856_v7 = vmul.f32 %v3733_v39, %v3716_v34  ;;  %v3860_v60 = vmul.f32 %v3737_v40, %v3719_v35  ;;  %v2919_v40 = vld [vmem:[%s5148_s3 + $0x18] sm:$0xff]  }
 0x1e5   : > { %698 = vadd.xlane.f32.xlu1 %v697_v31  ;;  %5207 = vst [vmem:[#allocation16_spill] sm:$0xff] %v3826_v59  ;;  %5208 = vst [vmem:[#allocation17_spill] sm:$0xff] %v3837_v27  ;;  %v3844_v31 = vrot.slane %v509_v48, %v3603_v57  ;;  %v709_v62 = vadd.f32 %v636_v17, %v635_v16  ;;  %v639_v61 = vmul.f32 %v3822_v18, %v3822_v18 }
 0x1e6   : > { %701 = vadd.xlane.f32.xlu0 %v700_v42  ;;  %5209 = vst [vmem:[#allocation18_spill] sm:$0xff] %v3841_v30  ;;  %v3848_v42 = vmul.f32 %v3733_v39, %v3726_v37  ;;  %5212 = vst [vmem:[#allocation21_spill] sm:$0xff] %v3852_v47  ;;  %v640_v43 = vmul.f32 %v3826_v59, %v3826_v59  ;;  %v712_v39 = vadd.f32 %v638_v26, %v637_v22  ;;  %v2920_v26 = vld [vmem:[%s5148_s3 + $0x50] sm:$0xff]  }
 0x1e7   : > { %5210 = vst [vmem:[#allocation19_spill] sm:$0xff] %v3844_v31  ;;  %5213 = vst [vmem:[#allocation22_spill] sm:$0xff] %v3856_v7  ;;  %v641_v32 = vmul.f32 %v3837_v27, %v3837_v27  ;;  %v646_v17 = vmul.f32 %v3852_v47, %v3852_v47  ;;  %v643_v21 = vmul.f32 %v3856_v7, %v3856_v7 }
 0x1e8   : > { %5211 = vst [vmem:[#allocation20_spill] sm:$0xff] %v3848_v42  ;;  %5214 = vst [vmem:[#allocation23_spill] sm:$0xff] %v3860_v60  ;;  %v645_v16 = vmul.f32 %v3848_v42, %v3848_v42  ;;  %v644_v22 = vmul.f32 %v3860_v60, %v3860_v60  ;;  %v715_v27 = vadd.f32 %v640_v43, %v639_v61 }
 0x1e9   : > { %704 = vadd.xlane.f32.xlu1 %v703_v56  ;;  %v3866_v56 = vrot.slane %v509_v48, %v3605_v58  ;;  %v642_v48 = vmul.f32 %v3841_v30, %v3841_v30  ;;  %v3903_v7 = vmul.f32 %v3844_v31, %v3618_v63  ;;  %v3918_v60 = vmul.f32 %v3844_v31, %v3630_v3 }
 0x1ea   : > { %707 = vadd.xlane.f32.xlu0 %v706_v49  ;;  %v2918_v49 = vld [vmem:[%s5148_s3 + $0x58] sm:$0xff]   ;;  %v724_v43 = vadd.f32 %v646_v17, %v645_v16  ;;  %v721_v47 = vadd.f32 %v644_v22, %v643_v21  ;;  %v3933_v21 = vmul.f32 %v3844_v31, %v3648_v9 }
 0x1eb   : > { %5215 = vst [vmem:[#allocation24_spill] sm:$0xff] %v3866_v56  ;;  %2674 = vmatprep.subr.bf16.mxu1 %v2918_v49  ;;  %v2921_v49 = vld [vmem:[%s5148_s3 + $0x10] sm:$0xff]   ;;  %v718_v42 = vadd.f32 %v642_v48, %v641_v32  ;;  %5218 = vst [vmem:[#allocation27_spill] sm:$0xff] %v3903_v7  ;;  %v3907_v61 = vmul.f32 %v3866_v56, %v3621_v0  ;;  %v649_v16 = vmul.f32 %v3903_v7, %v3903_v7 }
 0x1ec   : > { %2675 = vmatpush3.bf16.msra.mxu1 %v2919_v40  ;;  %v2922_v40 = vld [vmem:[%s5148_s3 + $0x48] sm:$0xff]   ;;  %5220 = vst [vmem:[#allocation29_spill] sm:$0xff] %v3933_v21  ;;  %v3937_v22 = vmul.f32 %v3866_v56, %v3651_v10  ;;  %v3947_v7 = vmul.f32 %v3866_v56, %v3695_v25  ;;  %v653_v30 = vmul.f32 %v3933_v21, %v3933_v21 }
 0x1ed   : > { %710 = vadd.xlane.f32.xlu1 %v709_v62  ;;  %v3892_v62 = vmul.f32 %v3844_v31, %v3624_v1  ;;  %5219 = vst [vmem:[#allocation28_spill] sm:$0xff] %v3907_v61  ;;  %2676 = vmatprep.subr.bf16.mxu1 %v2920_v26  ;;  %v650_v17 = vmul.f32 %v3907_v61, %v3907_v61 }
 0x1ee   : > { %713 = vadd.xlane.f32.xlu0 %v712_v39  ;;  %v3896_v39 = vmul.f32 %v3866_v56, %v3627_v2  ;;  %v510_v26 = vcombine.high %v3653_v11, %v3653_v11  ;;  %v654_v59 = vmul.f32 %v3937_v22, %v3937_v22 }
 0x1ef   : > { %5216 = vst [vmem:[#allocation25_spill] sm:$0xff] %v3892_v62  ;;  %v647_v32 = vmul.f32 %v3892_v62, %v3892_v62  ;;  %v3951_v62 = vmul.f32 %v3844_v31, %v3664_v14  ;;  %v730_v18 = vadd.f32 %v650_v17, %v649_v16 }
 0x1f0   : > { %5217 = vst [vmem:[#allocation26_spill] sm:$0xff] %v3896_v39  ;;  %v648_v48 = vmul.f32 %v3896_v39, %v3896_v39  ;;  %2677 = vmatpush3.bf16.msra.mxu1 %v2921_v49  ;;  %v3943_v49 = vmul.f32 %v3844_v31, %v3680_v20  ;;  %v2925_v39 = vld [vmem:[%s5148_s3] sm:$0xff]   ;;  %v3983_v21 = vrot.slane %v510_v26, %v3605_v58 }
 0x1f1   : > { %716 = vadd.xlane.f32.xlu1 %v715_v27  ;;  %v3922_v27 = vmul.f32 %v3866_v56, %v3633_v4  ;;  %2678 = vmatprep.subr.bf16.mxu1 %v2922_v40  ;;  %5222 = vst [vmem:[#allocation31_spill] sm:$0xff] %v3951_v62  ;;  %v3955_v40 = vmul.f32 %v3866_v56, %v3667_v15 }
 0x1f2   : > { %719 = vadd.xlane.f32.xlu0 %v718_v42  ;;  %v2923_v42 = vld [vmem:[%s5148_s3 + $0x8] sm:$0xff]   ;;  %5221 = vst [vmem:[#allocation30_spill] sm:$0xff] %v3943_v49  ;;  %v727_v11 = vadd.f32 %v648_v48, %v647_v32  ;;  %v3972_v32 = vrot.slane %v510_v26, %v3603_v57  ;;  %v657_v48 = vmul.f32 %v3943_v49, %v3943_v49  ;;  %5224 = vst [vmem:[#allocation33_spill] sm:$0xff] %v3983_v21 }
 0x1f3   : > { %v652_v61 = vmul.f32 %v3922_v27, %v3922_v27  ;;  %v655_v16 = vmul.f32 %v3951_v62, %v3951_v62  ;;  %v656_v17 = vmul.f32 %v3955_v40, %v3955_v40  ;;  %v3987_v57 = vmul.f32 %v3844_v31, %v3716_v34 }
 0x1f4   : > { %2679 = vmatpush3.bf16.msra.mxu1 %v2923_v42  ;;  %5223 = vst [vmem:[#allocation32_spill] sm:$0xff] %v3972_v32  ;;  %v658_v42 = vmul.f32 %v3947_v7, %v3947_v7  ;;  %v3995_v49 = vmul.f32 %v3844_v31, %v3726_v37  ;;  %v3999_v62 = vmul.f32 %v3866_v56, %v3729_v38 }
 0x1f5   : > { %722 = vadd.xlane.f32.xlu1 %v721_v47  ;;  %v2924_v47 = vld [vmem:[%s5148_s3 + $0x40] sm:$0xff]   ;;  %v659_v26 = vmul.f32 %v3987_v57, %v3987_v57 }
 0x1f6   : > { %725 = vadd.xlane.f32.xlu0 %v724_v43  ;;  %v651_v43 = vmul.f32 %v3918_v60, %v3918_v60  ;;  %2680 = vmatprep.subr.bf16.mxu1 %v2924_v47  ;;  %v742_v58 = vadd.f32 %v658_v42, %v657_v48  ;;  %v662_v48 = vmul.f32 %v3999_v62, %v3999_v62 }
 0x1f7   : > { %v4019_v42 = vmul.f32 %v3972_v32, %v3618_v63  ;;  %v4039_v63 = vmul.f32 %v3983_v21, %v3633_v4 }
 0x1f8   : > { %v733_v47 = vadd.f32 %v652_v61, %v651_v43  ;;  %2681 = vmatpush3.bf16.msra.mxu1 %v2925_v39  ;;  %v739_v61 = vadd.f32 %v656_v17, %v655_v16  ;;  %v661_v39 = vmul.f32 %v3995_v49, %v3995_v49  ;;  %v4023_v16 = vmul.f32 %v3983_v21, %v3621_v0 }
 0x1f9   : > { %728 = vadd.xlane.f32.xlu1 %v727_v11  ;;  %v736_v11 = vadd.f32 %v654_v59, %v653_v30  ;;  %v4007_v59 = vmul.f32 %v3972_v32, %v3624_v1  ;;  %v4011_v30 = vmul.f32 %v3983_v21, %v3627_v2  ;;  %v4027_v1 = vmul.f32 %v3972_v32, %v3648_v9 }
 0x1fa   : > { %731 = vadd.xlane.f32.xlu0 %v730_v18  ;;  %v3991_v18 = vmul.f32 %v3866_v56, %v3719_v35  ;;  %v4031_v2 = vmul.f32 %v3983_v21, %v3651_v10  ;;  %v4035_v17 = vmul.f32 %v3972_v32, %v3630_v3  ;;  %v665_v10 = vmul.f32 %v4019_v42, %v4019_v42 }
 0x1fb   : > { %v664_v9 = vmul.f32 %v4011_v30, %v4011_v30  ;;  %v669_v3 = vmul.f32 %v4027_v1, %v4027_v1  ;;  %v4071_v56 = vmul.f32 %v3983_v21, %v3695_v25 }
 0x1fc   : > { %v660_v43 = vmul.f32 %v3991_v18, %v3991_v18  ;;  %v670_v4 = vmul.f32 %v4031_v2, %v4031_v2 }
 0x1fd   : > { %734 = vadd.xlane.f32.xlu1 %v733_v47  ;;  %v663_v47 = vmul.f32 %v4007_v59, %v4007_v59 }
 0x1fe   : > { %737 = vadd.xlane.f32.xlu0 %v736_v11  ;;  %v745_v0 = vadd.f32 %v660_v43, %v659_v26  ;;  %v748_v11 = vadd.f32 %v662_v48, %v661_v39  ;;  %v668_v26 = vmul.f32 %v4039_v63, %v4039_v63  ;;  %v4059_v39 = vmul.f32 %v3972_v32, %v3664_v14 }
 0x1ff   : > { %v751_v43 = vadd.f32 %v664_v9, %v663_v47  ;;  %v4063_v48 = vmul.f32 %v3983_v21, %v3667_v15  ;;  %v760_v47 = vadd.f32 %v670_v4, %v669_v3  ;;  %v4091_v3 = vmul.f32 %v3972_v32, %v3726_v37 }
 0x200   : > { %v671_v14 = vmul.f32 %v4059_v39, %v4059_v39  ;;  %v4095_v4 = vmul.f32 %v3983_v21, %v3729_v38 }
 0x201   : > { %740 = vadd.xlane.f32.xlu1 %v739_v61  ;;  %v667_v61 = vmul.f32 %v4035_v17, %v4035_v17  ;;  %v672_v15 = vmul.f32 %v4063_v48, %v4063_v48  ;;  %5225 = vst [vmem:[#allocation34_spill] sm:$0xff] %v4091_v3 }
 0x202   : > { %743 = vadd.xlane.f32.xlu0 %v742_v58  ;;  %v666_v58 = vmul.f32 %v4023_v16, %v4023_v16  ;;  %v678_v37 = vmul.f32 %v4095_v4, %v4095_v4 }
 0x203   : > { %v757_v9 = vadd.f32 %v668_v26, %v667_v61 }
 0x205   : > { %746 = vadd.xlane.f32.xlu1 %v745_v0  ;;  %v754_v0 = vadd.f32 %v666_v58, %v665_v10  ;;  %v4079_v10 = vmul.f32 %v3972_v32, %v3716_v34  ;;  %v674_v58 = vmul.f32 %v4071_v56, %v4071_v56  ;;  %v763_v34 = vadd.f32 %v672_v15, %v671_v14 }
 0x206   : > { %749 = vadd.xlane.f32.xlu0 %v748_v11  ;;  %v4067_v11 = vmul.f32 %v3972_v32, %v3680_v20  ;;  %v4083_v20 = vmul.f32 %v3983_v21, %v3719_v35 }
 0x207   : > { %v675_v35 = vmul.f32 %v4079_v10, %v4079_v10 }
 0x208   : > { %v673_v25 = vmul.f32 %v4067_v11, %v4067_v11  ;;  %v676_v61 = vmul.f32 %v4083_v20, %v4083_v20 }
 0x209   : > { %752 = vadd.xlane.f32.xlu1 %v751_v43  ;;  %v677_v43 = vmul.f32 %v4091_v3, %v4091_v3 }
 0x20a   : > { %755 = vadd.xlane.f32.xlu0 %v754_v0  ;;  %v766_v26 = vadd.f32 %v674_v58, %v673_v25  ;;  %v769_v38 = vadd.f32 %v676_v61, %v675_v35 }
 0x20b   : > { %v772_v0 = vadd.f32 %v678_v37, %v677_v43 }
 0x20d   : > { %758 = vadd.xlane.f32.xlu1 %v757_v9 }
 0x20e   : > { %761 = vadd.xlane.f32.xlu0 %v760_v47 }
 0x211   : > { %764 = vadd.xlane.f32.xlu1 %v763_v34 }
 0x212   : > { %767 = vadd.xlane.f32.xlu0 %v766_v26 }
 0x215   : > { %770 = vadd.xlane.f32.xlu1 %v769_v38  ;;  %v2926_v38 = vld [vmem:[%s5150_s5 + $0x18] sm:$0xff]  }
 0x216   : > { %773 = vadd.xlane.f32.xlu0 %v772_v0  ;;  %2838 = vmatprep.subr.bf16.mxu1 %v2926_v38 }
 0x217   : > { %2798 = vmatprep.subr.bf16.mxu0 %v2926_v38 }
 0x218   : > { %2799 = vmatpush3.bf16.msra.mxu0 %v2926_v38 }
 0x262   : > { %v684_v47 = vpop.xlane.xlu1 %683 }
 0x263   : > { %v776_v9 = vmax.f32 %v684_v47, 1e-24  ;;  %v681_v14 = vpop.xlane.xlu0 %680 }
 0x264   : > { %v775_v15 = vmax.f32 %v681_v14, 1e-24 }
 0x265   : > { %2940 = vrsqrt.f32 %v776_v9 }
 0x266   : > { %2942 = vrsqrt.f32 %v775_v15  ;;  %v687_v21 = vpop.xlane.xlu1 %686 }
 0x267   : > { %v777_v25 = vmax.f32 %v687_v21, 1e-24  ;;  %v690_v58 = vpop.xlane.xlu0 %689 }
 0x268   : > { %v778_v32 = vmax.f32 %v690_v58, 1e-24 }
 0x269   : > { %2944 = vrsqrt.f32 %v777_v25 }
 0x26a   : > { %2946 = vrsqrt.f32 %v778_v32  ;;  %v693_v31 = vpop.xlane.xlu1 %692 }
 0x26b   : > { %v779_v3 = vmax.f32 %v693_v31, 1e-24  ;;  %v696_v34 = vpop.xlane.xlu0 %695 }
 0x26c   : > { %v780_v26 = vmax.f32 %v696_v34, 1e-24 }
 0x26d   : > { %2948 = vrsqrt.f32 %v779_v3 }
 0x26e   : > { %2950 = vrsqrt.f32 %v780_v26  ;;  %v699_v35 = vpop.xlane.xlu1 %698 }
 0x26f   : > { %v781_v61 = vmax.f32 %v699_v35, 1e-24  ;;  %v702_v43 = vpop.xlane.xlu0 %701 }
 0x270   : > { %v782_v37 = vmax.f32 %v702_v43, 1e-24 }
 0x271   : > { %2952 = vrsqrt.f32 %v781_v61 }
 0x272   : > { %v2941_v0 = vpop.eup %2940  ;;  %2954 = vrsqrt.f32 %v782_v37  ;;  %v705_v31 = vpop.xlane.xlu1 %704 }
 0x273   : > { %v2943_v21 = vpop.eup %2942  ;;  %v842_v47 = vmul.f32 %v2941_v0, %v3641_v6  ;;  %v841_v32 = vmul.f32 %v2941_v0, %v3637_v5  ;;  %v708_v14 = vpop.xlane.xlu0 %707  ;;  %v783_v26 = vmax.f32 %v705_v31, 1e-24 }
 0x274   : > { %v840_v3 = vmul.f32 %v2943_v21, %v3657_v12  ;;  %v839_v9 = vmul.f32 %v2943_v21, %v3645_v8  ;;  %v784_v6 = vmax.f32 %v708_v14, 1e-24 }
 0x275   : > { %2956 = vrsqrt.f32 %v783_v26 }
 0x276   : > { %v2945_v15 = vpop.eup %2944  ;;  %v904_v25 = vpack.c.bf16 %v842_v47, %v840_v3  ;;  %v903_v58 = vpack.c.bf16 %v841_v32, %v839_v9  ;;  %2958 = vrsqrt.f32 %v784_v6  ;;  %v711_v0 = vpop.xlane.xlu1 %710 }
 0x277   : > { %v2947_v34 = vpop.eup %2946  ;;  %v844_v35 = vmul.f32 %v2945_v15, %v3677_v19  ;;  %v843_v8 = vmul.f32 %v2945_v15, %v3661_v13  ;;  %v714_v47 = vpop.xlane.xlu0 %713  ;;  %v785_v32 = vmax.f32 %v711_v0, 1e-24 }
 0x278   : > { %1102 = vmatprep.mubr.bf16.mxu1 %v904_v25  ;;  %v846_v5 = vmul.f32 %v2947_v34, %v3692_v24  ;;  %v845_v37 = vmul.f32 %v2947_v34, %v3688_v23  ;;  %v786_v3 = vmax.f32 %v714_v47, 1e-24 }
 0x279   : > { %1103 = vmatmul.mubr.bf16.vlgmr.msra.gmra.mxu1 %v903_v58  ;;  %2960 = vrsqrt.f32 %v785_v32 }
 0x27a   : > { %v2949_v61 = vpop.eup %2948  ;;  %v906_v43 = vpack.c.bf16 %v846_v5, %v844_v35  ;;  %2842 = vmatpush3.bf16.msra.mxu1 %v2926_v38  ;;  %v905_v24 = vpack.c.bf16 %v845_v37, %v843_v8  ;;  %2962 = vrsqrt.f32 %v786_v3  ;;  %v717_v14 = vpop.xlane.xlu1 %716 }
 0x27b   : > { %v2951_v12 = vpop.eup %2950  ;;  %v848_v21 = vmul.f32 %v2949_v61, %v3705_v29  ;;  %v847_v13 = vmul.f32 %v2949_v61, %v3701_v28  ;;  %v720_v15 = vpop.xlane.xlu0 %719  ;;  %v787_v25 = vmax.f32 %v717_v14, 1e-24 }
 0x27c   : > { %1110 = vmatprep.mubr.bf16.mxu1 %v906_v43  ;;  %v850_v19 = vmul.f32 %v2951_v12, %v3723_v36  ;;  %v849_v23 = vmul.f32 %v2951_v12, %v3713_v33  ;;  %v788_v26 = vmax.f32 %v720_v15, 1e-24 }
 0x27d   : > { %2964 = vrsqrt.f32 %v787_v25 }
 0x27e   : > { %v2953_v31 = vpop.eup %2952  ;;  %v908_v9 = vpack.c.bf16 %v850_v19, %v848_v21  ;;  %v907_v58 = vpack.c.bf16 %v849_v23, %v847_v13  ;;  %2966 = vrsqrt.f32 %v788_v26  ;;  %v723_v5 = vpop.xlane.xlu1 %722  ;;  %v5226_v13 = vld [vmem:[#allocation13_spill] sm:$0xff]  ;;  %v5227_v23 = vld [vmem:[#allocation14_spill] sm:$0xff] }
 0x27f   : > { %v2955_v38 = vpop.eup %2954  ;;  %v852_v29 = vmul.f32 %v2953_v31, %v3749_v46  ;;  %v851_v28 = vmul.f32 %v2953_v31, %v3745_v45  ;;  %v726_v61 = vpop.xlane.xlu0 %725  ;;  %v789_v43 = vmax.f32 %v723_v5, 1e-24  ;;  %v5231_v5 = vld [vmem:[#allocation17_spill] sm:$0xff] }
 0x280   : > { %v854_v36 = vmul.f32 %v2955_v38, %v3761_v51  ;;  %v853_v33 = vmul.f32 %v2955_v38, %v3757_v50  ;;  %v790_v37 = vmax.f32 %v726_v61, 1e-24  ;;  %v5232_v61 = vld [vmem:[#allocation23_spill] sm:$0xff] }
 0x281   : > { %1111 = vmatmul.mubr.bf16.gmra.mxu1 %v905_v24  ;;  %2968 = vrsqrt.f32 %v789_v43 }
 0x282   : > { %1118 = vmatprep.mubr.bf16.mxu1 %v908_v9  ;;  %v2957_v34 = vpop.eup %2956  ;;  %v910_v35 = vpack.c.bf16 %v854_v36, %v852_v29  ;;  %v909_v12 = vpack.c.bf16 %v853_v33, %v851_v28  ;;  %2970 = vrsqrt.f32 %v790_v37  ;;  %v729_v19 = vpop.xlane.xlu1 %728  ;;  %v5228_v29 = vld [vmem:[#allocation16_spill] sm:$0xff]  ;;  %v5229_v36 = vld [vmem:[#allocation18_spill] sm:$0xff]  ;;  %v5230_v28 = vld [vmem:[#allocation15_spill] sm:$0xff] }
 0x283   : > { %v2959_v6 = vpop.eup %2958  ;;  %v856_v46 = vmul.f32 %v2957_v34, %v3777_v55  ;;  %v855_v45 = vmul.f32 %v2957_v34, %v3773_v54  ;;  %v732_v47 = vpop.xlane.xlu0 %731  ;;  %v791_v32 = vmax.f32 %v729_v19, 1e-24 }
 0x284   : > { %v858_v51 = vmul.f32 %v2959_v6, %v3769_v53  ;;  %v857_v50 = vmul.f32 %v2959_v6, %v3765_v52  ;;  %v792_v3 = vmax.f32 %v732_v47, 1e-24 }
 0x285   : > { %2972 = vrsqrt.f32 %v791_v32  ;;  %v5235_v32 = vld [vmem:[#allocation20_spill] sm:$0xff] }
 0x286   : > { %v2961_v8 = vpop.eup %2960  ;;  %v912_v0 = vpack.c.bf16 %v858_v51, %v856_v46  ;;  %v911_v24 = vpack.c.bf16 %v857_v50, %v855_v45  ;;  %2974 = vrsqrt.f32 %v792_v3  ;;  %v735_v14 = vpop.xlane.xlu1 %734  ;;  %v5236_v3 = vld [vmem:[#allocation26_spill] sm:$0xff] }
 0x287   : > { %v2963_v21 = vpop.eup %2962  ;;  %v860_v55 = vmul.f32 %v2961_v8, %v3801_v41  ;;  %v859_v54 = vmul.f32 %v2961_v8, %v5226_v13  ;;  %v738_v15 = vpop.xlane.xlu0 %737  ;;  %v793_v25 = vmax.f32 %v735_v14, 1e-24 }
 0x288   : > { %v862_v53 = vmul.f32 %v2963_v21, %v3809_v44  ;;  %v861_v52 = vmul.f32 %v2963_v21, %v5227_v23  ;;  %v794_v26 = vmax.f32 %v738_v15, 1e-24 }
 0x289   : > { %1119 = vmatmul.mubr.bf16.gmra.mxu1 %v907_v58  ;;  %2976 = vrsqrt.f32 %v793_v25  ;;  %v5239_v25 = vld [vmem:[#allocation27_spill] sm:$0xff] }
 0x28a   : > { %1126 = vmatprep.mubr.bf16.mxu1 %v910_v35  ;;  %v2965_v31 = vpop.eup %2964  ;;  %v914_v9 = vpack.c.bf16 %v862_v53, %v860_v55  ;;  %v913_v58 = vpack.c.bf16 %v861_v52, %v859_v54  ;;  %2978 = vrsqrt.f32 %v794_v26  ;;  %v741_v51 = vpop.xlane.xlu1 %740  ;;  %v5234_v53 = vld [vmem:[#allocation22_spill] sm:$0xff] }
 0x28b   : > { %v2967_v38 = vpop.eup %2966  ;;  %v864_v41 = vmul.f32 %v2965_v31, %v5228_v29  ;;  %v863_v33 = vmul.f32 %v2965_v31, %v5230_v28  ;;  %v744_v37 = vpop.xlane.xlu0 %743 }
 0x28c   : > { %v866_v44 = vmul.f32 %v2967_v38, %v5229_v36  ;;  %v865_v46 = vmul.f32 %v2967_v38, %v5231_v5  ;;  %v796_v50 = vmax.f32 %v744_v37, 1e-24  ;;  %v5237_v38 = vld [vmem:[#allocation28_spill] sm:$0xff] }
 0x28e   : > { %v2969_v34 = vpop.eup %2968  ;;  %v916_v35 = vpack.c.bf16 %v866_v44, %v864_v41  ;;  %v915_v21 = vpack.c.bf16 %v865_v46, %v863_v33  ;;  %v747_v31 = vpop.xlane.xlu1 %746  ;;  %v5238_v44 = vld [vmem:[#allocation25_spill] sm:$0xff] }
 0x28f   : > { %v2971_v6 = vpop.eup %2970  ;;  %v868_v43 = vmul.f32 %v2969_v34, %v5232_v61  ;;  %v867_v47 = vmul.f32 %v2969_v34, %v5234_v53  ;;  %v750_v54 = vpop.xlane.xlu0 %749  ;;  %v797_v23 = vmax.f32 %v747_v31, 1e-24  ;;  %v2927_v53 = vld [vmem:[%s5150_s5 + $0x10] sm:$0xff]  }
 0x290   : > { %v798_v29 = vmax.f32 %v750_v54, 1e-24  ;;  %2839 = vmatprep.subr.bf16.mxu1 %v2927_v53  ;;  %2800 = vmatprep.subr.bf16.mxu0 %v2927_v53 }
 0x291   : > { %1127 = vmatmul.mubr.bf16.gmra.mxu1 %v909_v12  ;;  %v5233_v12 = vld [vmem:[#allocation21_spill] sm:$0xff]  ;;  %2801 = vmatpush3.bf16.msra.mxu0 %v2927_v53 }
 0x292   : > { %1134 = vmatprep.mubr.bf16.mxu1 %v912_v0  ;;  %v870_v8 = vmul.f32 %v2971_v6, %v5233_v12  ;;  %v795_v0 = vmax.f32 %v741_v51, 1e-24  ;;  %v2973_v45 = vpop.eup %2972  ;;  %v753_v34 = vpop.xlane.xlu1 %752  ;;  %v5240_v12 = vld [vmem:[#allocation29_spill] sm:$0xff]  ;;  %2843 = vmatpush3.bf16.msra.mxu1 %v2927_v53 }
 0x293   : > { %v2975_v55 = vpop.eup %2974  ;;  %v871_v15 = vmul.f32 %v2973_v45, %v5238_v44  ;;  %v799_v28 = vmax.f32 %v753_v34, 1e-24 }
 0x294   : > { %v918_v19 = vpack.c.bf16 %v870_v8, %v868_v43  ;;  %2980 = vrsqrt.f32 %v795_v0  ;;  %v874_v13 = vmul.f32 %v2975_v55, %v5237_v38 }
 0x295   : > { %2982 = vrsqrt.f32 %v796_v50 }
 0x296   : > { %v2977_v14 = vpop.eup %2976  ;;  %2984 = vrsqrt.f32 %v797_v23  ;;  %v759_v37 = vpop.xlane.xlu1 %758 }
 0x297   : > { %v2979_v36 = vpop.eup %2978  ;;  %2986 = vrsqrt.f32 %v798_v29  ;;  %v876_v26 = vmul.f32 %v2977_v14, %v3922_v27  ;;  %v875_v43 = vmul.f32 %v2977_v14, %v3918_v60  ;;  %v5241_v60 = vld [vmem:[#allocation31_spill] sm:$0xff] }
 0x298   : > { %2988 = vrsqrt.f32 %v799_v28  ;;  %v877_v8 = vmul.f32 %v2979_v36, %v5240_v12 }
 0x299   : > { %1135 = vmatmul.mubr.bf16.gmra.mxu1 %v911_v24  ;;  %v869_v24 = vmul.f32 %v2971_v6, %v5235_v32  ;;  %v756_v6 = vpop.xlane.xlu0 %755 }
 0x29a   : > { %1142 = vmatprep.mubr.bf16.mxu1 %v914_v9  ;;  %v872_v9 = vmul.f32 %v2973_v45, %v5236_v3  ;;  %v800_v46 = vmax.f32 %v756_v6, 1e-24  ;;  %v921_v45 = vpack.c.bf16 %v877_v8, %v875_v43 }
 0x29b   : > { %v917_v52 = vpack.c.bf16 %v869_v24, %v867_v47 }
 0x29c   : > { %v920_v41 = vpack.c.bf16 %v874_v13, %v872_v9  ;;  %2990 = vrsqrt.f32 %v800_v46 }
 0x29d   : > { %v762_v0 = vpop.xlane.xlu0 %761 }
 0x2a1   : > { %1143 = vmatmul.mubr.bf16.gmra.mxu1 %v913_v58  ;;  %v873_v58 = vmul.f32 %v2975_v55, %v5239_v25  ;;  %v2981_v5 = vpop.eup %2980  ;;  %v768_v9 = vpop.xlane.xlu0 %767 }
 0x2a2   : > { %1150 = vmatprep.mubr.bf16.mxu1 %v916_v35  ;;  %v878_v35 = vmul.f32 %v2979_v36, %v3937_v22  ;;  %v2983_v61 = vpop.eup %2982  ;;  %v880_v27 = vmul.f32 %v2981_v5, %v3955_v40  ;;  %v879_v32 = vmul.f32 %v2981_v5, %v5241_v60  ;;  %v5242_v40 = vld [vmem:[#allocation30_spill] sm:$0xff]  ;;  %v804_v23 = vmax.f32 %v768_v9, 1e-24 }
 0x2a3   : > { %v919_v33 = vpack.c.bf16 %v873_v58, %v871_v15  ;;  %v882_v22 = vmul.f32 %v2983_v61, %v3947_v7  ;;  %v2985_v50 = vpop.eup %2984  ;;  %v881_v24 = vmul.f32 %v2983_v61, %v5242_v40  ;;  %v765_v7 = vpop.xlane.xlu1 %764  ;;  %v2928_v5 = vld [vmem:[%s5150_s5 + $0x8] sm:$0xff]  }
 0x2a4   : > { %v922_v51 = vpack.c.bf16 %v878_v35, %v876_v26  ;;  %v2987_v47 = vpop.eup %2986  ;;  %v884_v31 = vmul.f32 %v2985_v50, %v3991_v18  ;;  %v803_v38 = vmax.f32 %v765_v7, 1e-24  ;;  %v883_v29 = vmul.f32 %v2985_v50, %v3987_v57  ;;  %2802 = vmatprep.subr.bf16.mxu0 %v2928_v5  ;;  %2840 = vmatprep.subr.bf16.mxu1 %v2928_v5 }
 0x2a5   : > { %v924_v55 = vpack.c.bf16 %v882_v22, %v880_v27  ;;  %v886_v3 = vmul.f32 %v2987_v47, %v3999_v62  ;;  %v923_v13 = vpack.c.bf16 %v881_v24, %v879_v32  ;;  %v2989_v54 = vpop.eup %2988  ;;  %v774_v44 = vpop.xlane.xlu0 %773  ;;  %2803 = vmatpush3.bf16.msra.mxu0 %v2928_v5  ;;  %2844 = vmatpush3.bf16.msra.mxu1 %v2928_v5 }
 0x2a6   : > { %v888_v18 = vmul.f32 %v2989_v54, %v4011_v30  ;;  %v806_v34 = vmax.f32 %v774_v44, 1e-24  ;;  %v887_v57 = vmul.f32 %v2989_v54, %v4007_v59 }
 0x2a7   : > { %v771_v36 = vpop.xlane.xlu1 %770 }
 0x2a8   : > { %v805_v15 = vmax.f32 %v771_v36, 1e-24 }
 0x2a9   : > { %1151 = vmatmul.mubr.bf16.gmra.mxu1 %v915_v21  ;;  %v801_v21 = vmax.f32 %v759_v37, 1e-24  ;;  %v2991_v14 = vpop.eup %2990 }
 0x2aa   : > { %1158 = vmatprep.mubr.bf16.mxu1 %v918_v19  ;;  %v802_v19 = vmax.f32 %v762_v0, 1e-24  ;;  %v890_v62 = vmul.f32 %v2991_v14, %v4023_v16 }
 0x2ab   : > { %2992 = vrsqrt.f32 %v801_v21  ;;  %v5243_v21 = vld [vmem:[#allocation34_spill] sm:$0xff] }
 0x2ac   : > { %2994 = vrsqrt.f32 %v802_v19  ;;  %v928_v26 = vpack.c.bf16 %v890_v62, %v888_v18 }
 0x2ad   : > { %2996 = vrsqrt.f32 %v803_v38 }
 0x2ae   : > { %2998 = vrsqrt.f32 %v804_v23 }
 0x2af   : > { %3000 = vrsqrt.f32 %v805_v15 }
 0x2b0   : > { %3002 = vrsqrt.f32 %v806_v34 }
 0x2b1   : > { %1159 = vmatmul.mubr.bf16.gmra.mxu1 %v917_v52  ;;  %v926_v52 = vpack.c.bf16 %v886_v3, %v884_v31 }
 0x2b2   : > { %1166 = vmatprep.mubr.bf16.mxu1 %v920_v41  ;;  %v885_v41 = vmul.f32 %v2987_v47, %v3995_v49  ;;  %v889_v49 = vmul.f32 %v2991_v14, %v4019_v42 }
 0x2b4   : > { %v925_v25 = vpack.c.bf16 %v885_v41, %v883_v29  ;;  %v927_v16 = vpack.c.bf16 %v889_v49, %v887_v57 }
 0x2b8   : > { %v2993_v58 = vpop.eup %2992 }
 0x2b9   : > { %1167 = vmatmul.mubr.bf16.gmra.mxu1 %v919_v33  ;;  %v2995_v35 = vpop.eup %2994  ;;  %v892_v6 = vmul.f32 %v2993_v58, %v4039_v63  ;;  %v891_v59 = vmul.f32 %v2993_v58, %v4035_v17 }
 0x2ba   : > { %1174 = vmatprep.mubr.bf16.mxu1 %v922_v51  ;;  %v894_v30 = vmul.f32 %v2995_v35, %v4031_v2  ;;  %v2997_v28 = vpop.eup %2996  ;;  %v893_v42 = vmul.f32 %v2995_v35, %v4027_v1  ;;  %v2929_v51 = vld [vmem:[%s5150_s5] sm:$0xff]   ;;  %v3292_v1 = vld [vmem:[%s5146_s1 + $0x34] ss:$8 sps:$4 sm:$0xff]  }
 0x2bb   : > { %v2999_v46 = vpop.eup %2998  ;;  %v896_v63 = vmul.f32 %v2997_v28, %v4063_v48  ;;  %2804 = vmatprep.subr.bf16.mxu0 %v2929_v51  ;;  %2841 = vmatprep.subr.bf16.mxu1 %v2929_v51 }
 0x2bc   : > { %v930_v33 = vpack.c.bf16 %v894_v30, %v892_v6  ;;  %v898_v2 = vmul.f32 %v2999_v46, %v4071_v56  ;;  %v929_v61 = vpack.c.bf16 %v893_v42, %v891_v59  ;;  %2805 = vmatpush3.bf16.msra.mxu0 %v2929_v51  ;;  %v3001_v43 = vpop.eup %3000  ;;  %2845 = vmatpush3.bf16.msra.mxu1 %v2929_v51  ;;  %v3294_v59 = vld [vmem:[%s5146_s1 + $0x24] ss:$8 sps:$4 sm:$0xff]  }
 0x2bd   : > { %1986 = vmatprep.subr.bf16.mxu0 %v3292_v1  ;;  %v3003_v17 = vpop.eup %3002  ;;  %v895_v56 = vmul.f32 %v2997_v28, %v4059_v39  ;;  %v897_v48 = vmul.f32 %v2999_v46, %v4067_v11  ;;  %v900_v8 = vmul.f32 %v3001_v43, %v4083_v20  ;;  %v899_v0 = vmul.f32 %v3001_v43, %v4079_v10  ;;  %v4187_v39 = vld [vmem:[%s5149_s4] ss:$0 sm:$0xff]  ;;  %v3293_v46 = vld [vmem:[%s5146_s1 + $0x30] ss:$8 sps:$4 sm:$0xff]  }
 0x2be   : > { %v932_v12 = vpack.c.bf16 %v898_v2, %v896_v63  ;;  %v902_v37 = vmul.f32 %v3003_v17, %v4095_v4 }
 0x2bf   : > { %v931_v27 = vpack.c.bf16 %v897_v48, %v895_v56  ;;  %v3296_v56 = vld [vmem:[%s5146_s1 + $0x14] ss:$8 sps:$4 sm:$0xff]  }
 0x2c0   : > { %v934_v22 = vpack.c.bf16 %v902_v37, %v900_v8 }
 0x2c1   : > { %1175 = vmatmul.mubr.bf16.gmra.mxu1 %v921_v45  ;;  %v901_v45 = vmul.f32 %v3003_v17, %v5243_v21 }
 0x2c2   : > { %1182 = vmatprep.mubr.bf16.mxu1 %v924_v55 }
 0x2c3   : > { %v933_v50 = vpack.c.bf16 %v901_v45, %v899_v0 }
 0x2c9   : > { %1183 = vmatmul.mubr.bf16.gmra.mxu1 %v923_v13 }
 0x2ca   : > { %1190 = vmatprep.mubr.bf16.mxu1 %v926_v52 }
 0x2d1   : > { %1191 = vmatmul.mubr.bf16.gmra.mxu1 %v925_v25 }
 0x2d2   : > { %1198 = vmatprep.mubr.bf16.mxu1 %v928_v26 }
 0x2d9   : > { %1199 = vmatmul.mubr.bf16.gmra.mxu1 %v927_v16 }
 0x2da   : > { %1206 = vmatprep.mubr.bf16.mxu1 %v930_v33 }
 0x2e1   : > { %1207 = vmatmul.mubr.bf16.gmra.mxu1 %v929_v61 }
 0x2e2   : > { %1214 = vmatprep.mubr.bf16.mxu1 %v932_v12  ;;  %v3295_v12 = vld [vmem:[%s5146_s1 + $0x20] ss:$8 sps:$4 sm:$0xff]  }
 0x2e9   : > { %1215 = vmatmul.mubr.bf16.gmra.mxu1 %v931_v27  ;;  %v3297_v27 = vld [vmem:[%s5146_s1 + $0x10] ss:$8 sps:$4 sm:$0xff]  }
 0x2ea   : > { %1222 = vmatprep.mubr.bf16.mxu1 %v934_v22  ;;  %v3298_v22 = vld [vmem:[%s5146_s1 + $0x4] ss:$8 sps:$4 sm:$0xff]  }
 0x2f1   : > { %1223 = vmatmul.mubr.bf16.gmra.mxu1 %v933_v50 }
 0x339   : > { %v2682_v19 = vpop.f32.mrf.mxu1 }
 0x33b   : > { %v2683_v55 = vpop.f32.mrf.mxu1 }
 0x33c   : > { %v2684_v11 = vadd.f32 %v2683_v55, %v2682_v19 }
 0x33d   : > { %v2685_v20 = vpop.f32.mrf.mxu1 }
 0x33e   : > { %v1105_v4 = vadd.f32 %v2684_v11, %v4187_v39  ;;  %v3299_v11 = vld [vmem:[%s5146_s1] ss:$8 sps:$4 sm:$0xff]  }
 0x33f   : > { %v2686_v53 = vpop.f32.mrf.mxu1 }
 0x340   : > { %v2687_v47 = vadd.f32 %v2686_v53, %v2685_v20  ;;  %3004 = vtanh.f32 %v1105_v4 }
 0x341   : > { %v2688_v60 = vpop.f32.mrf.mxu1 }
 0x342   : > { %v1108_v10 = vadd.f32 %v2687_v47, %v4187_v39 }
 0x343   : > { %v2689_v32 = vpop.f32.mrf.mxu1 }
 0x344   : > { %3006 = vtanh.f32 %v1108_v10  ;;  %v2690_v40 = vadd.f32 %v2689_v32, %v2688_v60 }
 0x345   : > { %v2691_v24 = vpop.f32.mrf.mxu1 }
 0x346   : > { %v1113_v7 = vadd.f32 %v2690_v40, %v4187_v39 }
 0x347   : > { %v2692_v31 = vpop.f32.mrf.mxu1 }
 0x348   : > { %v2693_v3 = vadd.f32 %v2692_v31, %v2691_v24  ;;  %3008 = vtanh.f32 %v1113_v7 }
 0x349   : > { %v2694_v9 = vpop.f32.mrf.mxu1 }
 0x34a   : > { %v1116_v38 = vadd.f32 %v2693_v3, %v4187_v39 }
 0x34b   : > { %v2695_v13 = vpop.f32.mrf.mxu1 }
 0x34c   : > { %3010 = vtanh.f32 %v1116_v38  ;;  %v2696_v54 = vadd.f32 %v2695_v13, %v2694_v9 }
 0x34d   : > { %v2697_v23 = vpop.f32.mrf.mxu1  ;;  %v3005_v29 = vpop.eup %3004 }
 0x34e   : > { %v1121_v52 = vadd.f32 %v2696_v54, %v4187_v39 }
 0x34f   : > { %v2698_v14 = vpop.f32.mrf.mxu1 }
 0x350   : > { %v2699_v41 = vadd.f32 %v2698_v14, %v2697_v23  ;;  %3012 = vtanh.f32 %v1121_v52 }
 0x351   : > { %v3007_v36 = vpop.eup %3006  ;;  %v2700_v18 = vpop.f32.mrf.mxu1 }
 0x352   : > { %v1124_v62 = vadd.f32 %v2699_v41, %v4187_v39  ;;  %v1263_v44 = vpack.c.bf16 %v3007_v36, %v3005_v29 }
 0x353   : > { %v2701_v15 = vpop.f32.mrf.mxu1 }
 0x354   : > { %3014 = vtanh.f32 %v1124_v62  ;;  %v2702_v25 = vadd.f32 %v2701_v15, %v2700_v18  ;;  %2806 = vmatprep.mubr.msk.bf16.mxu0 %vm400_vm1, %v1263_v44 }
 0x355   : > { %v2703_v58 = vpop.f32.mrf.mxu1  ;;  %v3009_v35 = vpop.eup %3008 }
 0x356   : > { %v1129_v34 = vadd.f32 %v2702_v25, %v4187_v39 }
 0x357   : > { %v2704_v26 = vpop.f32.mrf.mxu1 }
 0x358   : > { %v2705_v57 = vadd.f32 %v2704_v26, %v2703_v58  ;;  %3016 = vtanh.f32 %v1129_v34 }
 0x359   : > { %v3011_v49 = vpop.eup %3010  ;;  %v2706_v6 = vpop.f32.mrf.mxu1 }
 0x35a   : > { %v1132_v30 = vadd.f32 %v2705_v57, %v4187_v39  ;;  %v1264_v16 = vpack.c.bf16 %v3011_v49, %v3009_v35 }
 0x35b   : > { %v2707_v28 = vpop.f32.mrf.mxu1 }
 0x35c   : > { %3018 = vtanh.f32 %v1132_v30  ;;  %v2708_v33 = vadd.f32 %v2707_v28, %v2706_v6  ;;  %2807 = vmatmul.mubr.msk.bf16.vlgmr.msra.gmra.mxu0 %vm400_vm1, %v1264_v16 }
 0x35d   : > { %v2709_v5 = vpop.f32.mrf.mxu1  ;;  %1987 = vmatpush1.bf16.msra.mxu0 %v3293_v46  ;;  %v3013_v2 = vpop.eup %3012 }
 0x35e   : > { %1988 = vmatprep.subr.bf16.mxu0 %v3294_v59  ;;  %v1137_v42 = vadd.f32 %v2708_v33, %v4187_v39 }
 0x35f   : > { %v2710_v63 = vpop.f32.mrf.mxu1 }
 0x360   : > { %v2711_v51 = vadd.f32 %v2710_v63, %v2709_v5  ;;  %3020 = vtanh.f32 %v1137_v42 }
 0x361   : > { %v3015_v61 = vpop.eup %3014  ;;  %v2712_v43 = vpop.f32.mrf.mxu1  ;;  %1989 = vmatpush1.bf16.msra.mxu0 %v3295_v12 }
 0x362   : > { %v1140_v1 = vadd.f32 %v2711_v51, %v4187_v39  ;;  %v1265_v17 = vpack.c.bf16 %v3015_v61, %v3013_v2  ;;  %1990 = vmatprep.subr.bf16.mxu0 %v3296_v56 }
 0x363   : > { %v2713_v48 = vpop.f32.mrf.mxu1 }
 0x364   : > { %3022 = vtanh.f32 %v1140_v1  ;;  %v2714_v8 = vadd.f32 %v2713_v48, %v2712_v43  ;;  %2810 = vmatprep.mubr.msk.bf16.mxu0 %vm400_vm1, %v1265_v17  ;;  %v5244_v17 = vmov 0  }
 0x365   : > { %v2715_v37 = vpop.f32.mrf.mxu1  ;;  %1991 = vmatpush1.bf16.msra.mxu0 %v3297_v27  ;;  %v3017_v45 = vpop.eup %3016 }
 0x366   : > { %1992 = vmatprep.subr.bf16.mxu0 %v3298_v22  ;;  %v1145_v0 = vadd.f32 %v2714_v8, %v4187_v39 }
 0x367   : > { %v2716_v21 = vpop.f32.mrf.mxu1 }
 0x368   : > { %v2717_v50 = vadd.f32 %v2716_v21, %v2715_v37  ;;  %3024 = vtanh.f32 %v1145_v0 }
 0x369   : > { %v3019_v19 = vpop.eup %3018  ;;  %v2718_v55 = vpop.f32.mrf.mxu1  ;;  %1993 = vmatpush1.bf16.msra.mxu0 %v3299_v11 }
 0x36a   : > { %v1148_v20 = vadd.f32 %v2717_v50, %v4187_v39  ;;  %v1266_v4 = vpack.c.bf16 %v3019_v19, %v3017_v45 }
 0x36b   : > { %v2719_v53 = vpop.f32.mrf.mxu1 }
 0x36c   : > { %3026 = vtanh.f32 %v1148_v20  ;;  %v2720_v47 = vadd.f32 %v2719_v53, %v2718_v55  ;;  %2811 = vmatmul.mubr.msk.bf16.gmra.mxu0 %vm400_vm1, %v1266_v4 }
 0x36d   : > { %v2721_v60 = vpop.f32.mrf.mxu1  ;;  %v3021_v40 = vpop.eup %3020 }
 0x36e   : > { %v1153_v10 = vadd.f32 %v2720_v47, %v4187_v39 }
 0x36f   : > { %v2722_v32 = vpop.f32.mrf.mxu1 }
 0x370   : > { %v2723_v24 = vadd.f32 %v2722_v32, %v2721_v60  ;;  %3028 = vtanh.f32 %v1153_v10 }
 0x371   : > { %v3023_v7 = vpop.eup %3022  ;;  %v2724_v31 = vpop.f32.mrf.mxu1 }
 0x372   : > { %v1156_v3 = vadd.f32 %v2723_v24, %v4187_v39  ;;  %v1267_v9 = vpack.c.bf16 %v3023_v7, %v3021_v40 }
 0x373   : > { %v2725_v38 = vpop.f32.mrf.mxu1 }
 0x374   : > { %3030 = vtanh.f32 %v1156_v3  ;;  %v2726_v13 = vadd.f32 %v2725_v38, %v2724_v31  ;;  %2814 = vmatprep.mubr.msk.bf16.mxu0 %vm400_vm1, %v1267_v9 }
 0x375   : > { %v2727_v54 = vpop.f32.mrf.mxu1  ;;  %v3025_v14 = vpop.eup %3024 }
 0x376   : > { %v1161_v23 = vadd.f32 %v2726_v13, %v4187_v39 }
 0x377   : > { %v2728_v52 = vpop.f32.mrf.mxu1 }
 0x378   : > { %v2729_v29 = vadd.f32 %v2728_v52, %v2727_v54  ;;  %3032 = vtanh.f32 %v1161_v23 }
 0x379   : > { %v3027_v41 = vpop.eup %3026  ;;  %v2730_v36 = vpop.f32.mrf.mxu1 }
 0x37a   : > { %v1164_v18 = vadd.f32 %v2729_v29, %v4187_v39  ;;  %v1268_v62 = vpack.c.bf16 %v3027_v41, %v3025_v14 }
 0x37b   : > { %v2731_v44 = vpop.f32.mrf.mxu1 }
 0x37c   : > { %3034 = vtanh.f32 %v1164_v18  ;;  %v2732_v15 = vadd.f32 %v2731_v44, %v2730_v36  ;;  %2815 = vmatmul.mubr.msk.bf16.gmra.mxu0 %vm400_vm1, %v1268_v62 }
 0x37d   : > { %v2733_v25 = vpop.f32.mrf.mxu1  ;;  %v3029_v26 = vpop.eup %3028 }
 0x37e   : > { %v1169_v58 = vadd.f32 %v2732_v15, %v4187_v39 }
 0x37f   : > { %v2734_v34 = vpop.f32.mrf.mxu1 }
 0x380   : > { %v2735_v35 = vadd.f32 %v2734_v34, %v2733_v25  ;;  %3036 = vtanh.f32 %v1169_v58 }
 0x381   : > { %v3031_v57 = vpop.eup %3030  ;;  %v2736_v49 = vpop.f32.mrf.mxu1 }
 0x382   : > { %v1172_v6 = vadd.f32 %v2735_v35, %v4187_v39  ;;  %v1269_v30 = vpack.c.bf16 %v3031_v57, %v3029_v26 }
 0x383   : > { %v2737_v16 = vpop.f32.mrf.mxu1 }
 0x384   : > { %3038 = vtanh.f32 %v1172_v6  ;;  %v2738_v28 = vadd.f32 %v2737_v16, %v2736_v49  ;;  %2818 = vmatprep.mubr.msk.bf16.mxu0 %vm400_vm1, %v1269_v30 }
 0x385   : > { %v2739_v33 = vpop.f32.mrf.mxu1  ;;  %v3033_v59 = vpop.eup %3032 }
 0x386   : > { %v1177_v5 = vadd.f32 %v2738_v28, %v4187_v39 }
 0x387   : > { %v2740_v46 = vpop.f32.mrf.mxu1 }
 0x388   : > { %v2741_v42 = vadd.f32 %v2740_v46, %v2739_v33  ;;  %3040 = vtanh.f32 %v1177_v5 }
 0x389   : > { %v3035_v63 = vpop.eup %3034  ;;  %v2742_v2 = vpop.f32.mrf.mxu1 }
 0x38a   : > { %v1180_v51 = vadd.f32 %v2741_v42, %v4187_v39  ;;  %v1270_v61 = vpack.c.bf16 %v3035_v63, %v3033_v59 }
 0x38b   : > { %v2743_v43 = vpop.f32.mrf.mxu1 }
 0x38c   : > { %3042 = vtanh.f32 %v1180_v51  ;;  %v2744_v12 = vadd.f32 %v2743_v43, %v2742_v2  ;;  %2819 = vmatmul.mubr.msk.bf16.gmra.mxu0 %vm400_vm1, %v1270_v61 }
 0x38d   : > { %v2745_v1 = vpop.f32.mrf.mxu1  ;;  %2010 = vmatprep.mubr.bf16.mxu0 %v5244_v17  ;;  %v3037_v8 = vpop.eup %3036 }
 0x38e   : > { %v1185_v56 = vadd.f32 %v2744_v12, %v4187_v39 }
 0x38f   : > { %v2746_v48 = vpop.f32.mrf.mxu1 }
 0x390   : > { %v2747_v37 = vadd.f32 %v2746_v48, %v2745_v1  ;;  %3044 = vtanh.f32 %v1185_v56 }
 0x391   : > { %v3039_v27 = vpop.eup %3038  ;;  %v2748_v22 = vpop.f32.mrf.mxu1 }
 0x392   : > { %v1188_v0 = vadd.f32 %v2747_v37, %v4187_v39  ;;  %v1271_v21 = vpack.c.bf16 %v3039_v27, %v3037_v8 }
 0x393   : > { %v2749_v45 = vpop.f32.mrf.mxu1 }
 0x394   : > { %3046 = vtanh.f32 %v1188_v0  ;;  %v2750_v50 = vadd.f32 %v2749_v45, %v2748_v22  ;;  %2822 = vmatprep.mubr.msk.bf16.mxu1 %vm400_vm1, %v1271_v21  ;;  %v4262_v0 = vld [vmem:[%s5151_s6] ss:$0 sm:$0xff]  ;;  %v5245_v45 = vlaneseq }
 0x395   : > { %v2751_v19 = vpop.f32.mrf.mxu1  ;;  %v3041_v20 = vpop.eup %3040 }
 0x396   : > { %v1193_v55 = vadd.f32 %v2750_v50, %v4187_v39  ;;  %v4268_v50 = vand.u32 127, %v5245_v45 }
 0x397   : > { %v2752_v11 = vpop.f32.mrf.mxu1 }
 0x398   : > { %v2753_v4 = vadd.f32 %v2752_v11, %v2751_v19  ;;  %3048 = vtanh.f32 %v1193_v55  ;;  %vm1529_vm3 = vcmp.lt.s32.totalorder %v4268_v50, 32 }
 0x399   : > { %v3043_v53 = vpop.eup %3042  ;;  %v2754_v47 = vpop.f32.mrf.mxu1 }
 0x39a   : > { %v1272_v60 = vpack.c.bf16 %v3043_v53, %v3041_v20  ;;  %v1196_v10 = vadd.f32 %v2753_v4, %v4187_v39 }
 0x39b   : > { %v2755_v32 = vpop.f32.mrf.mxu1 }
 0x39c   : > { %3050 = vtanh.f32 %v1196_v10  ;;  %v2756_v40 = vadd.f32 %v2755_v32, %v2754_v47  ;;  %2823 = vmatmul.mubr.msk.bf16.vlgmr.msra.gmra.mxu1 %vm400_vm1, %v1272_v60 }
 0x39d   : > { %v2757_v24 = vpop.f32.mrf.mxu1  ;;  %v3045_v3 = vpop.eup %3044 }
 0x39e   : > { %v1201_v7 = vadd.f32 %v2756_v40, %v4187_v39 }
 0x39f   : > { %v2758_v31 = vpop.f32.mrf.mxu1 }
 0x3a0   : > { %v2759_v9 = vadd.f32 %v2758_v31, %v2757_v24  ;;  %3052 = vtanh.f32 %v1201_v7 }
 0x3a1   : > { %v3047_v38 = vpop.eup %3046  ;;  %v2760_v13 = vpop.f32.mrf.mxu1 }
 0x3a2   : > { %v1204_v54 = vadd.f32 %v2759_v9, %v4187_v39  ;;  %v1273_v23 = vpack.c.bf16 %v3047_v38, %v3045_v3 }
 0x3a3   : > { %v2761_v52 = vpop.f32.mrf.mxu1 }
 0x3a4   : > { %3054 = vtanh.f32 %v1204_v54  ;;  %v2762_v14 = vadd.f32 %v2761_v52, %v2760_v13  ;;  %2826 = vmatprep.mubr.msk.bf16.mxu1 %vm400_vm1, %v1273_v23 }
 0x3a5   : > { %v2763_v29 = vpop.f32.mrf.mxu1  ;;  %v3049_v18 = vpop.eup %3048 }
 0x3a6   : > { %v1209_v41 = vadd.f32 %v2762_v14, %v4187_v39 }
 0x3a7   : > { %v2764_v36 = vpop.f32.mrf.mxu1 }
 0x3a8   : > { %v2765_v62 = vadd.f32 %v2764_v36, %v2763_v29  ;;  %3056 = vtanh.f32 %v1209_v41 }
 0x3a9   : > { %v3051_v44 = vpop.eup %3050  ;;  %v2766_v15 = vpop.f32.mrf.mxu1 }
 0x3aa   : > { %v1212_v25 = vadd.f32 %v2765_v62, %v4187_v39  ;;  %v1274_v58 = vpack.c.bf16 %v3051_v44, %v3049_v18 }
 0x3ab   : > { %v2767_v34 = vpop.f32.mrf.mxu1 }
 0x3ac   : > { %3058 = vtanh.f32 %v1212_v25  ;;  %v2768_v26 = vadd.f32 %v2767_v34, %v2766_v15  ;;  %2827 = vmatmul.mubr.msk.bf16.gmra.mxu1 %vm400_vm1, %v1274_v58 }
 0x3ad   : > { %v2769_v35 = vpop.f32.mrf.mxu1  ;;  %v3053_v6 = vpop.eup %3052 }
 0x3ae   : > { %v1217_v57 = vadd.f32 %v2768_v26, %v4187_v39 }
 0x3af   : > { %v2770_v49 = vpop.f32.mrf.mxu1 }
 0x3b0   : > { %v2771_v30 = vadd.f32 %v2770_v49, %v2769_v35  ;;  %3060 = vtanh.f32 %v1217_v57 }
 0x3b1   : > { %v3055_v16 = vpop.eup %3054  ;;  %v2772_v28 = vpop.f32.mrf.mxu1 }
 0x3b2   : > { %v1220_v33 = vadd.f32 %v2771_v30, %v4187_v39  ;;  %v1275_v5 = vpack.c.bf16 %v3055_v16, %v3053_v6 }
 0x3b3   : > { %v2773_v46 = vpop.f32.mrf.mxu1 }
 0x3b4   : > { %3062 = vtanh.f32 %v1220_v33  ;;  %v2774_v59 = vadd.f32 %v2773_v46, %v2772_v28  ;;  %2830 = vmatprep.mubr.msk.bf16.mxu1 %vm400_vm1, %v1275_v5 }
 0x3b5   : > { %v2775_v42 = vpop.f32.mrf.mxu1  ;;  %v3057_v51 = vpop.eup %3056 }
 0x3b6   : > { %v1225_v63 = vadd.f32 %v2774_v59, %v4187_v39 }
 0x3b7   : > { %v2776_v2 = vpop.f32.mrf.mxu1 }
 0x3b8   : > { %v2777_v61 = vadd.f32 %v2776_v2, %v2775_v42  ;;  %3064 = vtanh.f32 %v1225_v63 }
 0x3b9   : > { %v3059_v43 = vpop.eup %3058 }
 0x3ba   : > { %v1228_v12 = vadd.f32 %v2777_v61, %v4187_v39  ;;  %v1276_v1 = vpack.c.bf16 %v3059_v43, %v3057_v51 }
 0x3bc   : > { %3066 = vtanh.f32 %v1228_v12  ;;  %2831 = vmatmul.mubr.msk.bf16.gmra.mxu1 %vm400_vm1, %v1276_v1 }
 0x3bd   : > { %v3061_v56 = vpop.eup %3060 }
 0x3c1   : > { %v3063_v48 = vpop.eup %3062 }
 0x3c2   : > { %v1277_v8 = vpack.c.bf16 %v3063_v48, %v3061_v56 }
 0x3c4   : > { %2834 = vmatprep.mubr.msk.bf16.mxu1 %vm400_vm1, %v1277_v8 }
 0x3c5   : > { %v3065_v37 = vpop.eup %3064 }
 0x3c9   : > { %v3067_v27 = vpop.eup %3066 }
 0x3ca   : > { %v1278_v22 = vpack.c.bf16 %v3067_v27, %v3065_v37 }
 0x3cc   : > { %2835 = vmatmul.mubr.msk.bf16.gmra.mxu1 %vm400_vm1, %v1278_v22 }
 0x41c   : > { %v2808_v39 = vpop.f32.mrf.mxu0 }
 0x41d   : > { %v4265_v21 = vadd.f32 %v2808_v39, %v4262_v0 }
 0x41e   : > { %v1400_v19 = vpop.f32.mrf.mxu0 }
 0x41f   : > { %v4271_v55 = vadd.f32 %v4262_v0, %v1400_v19  ;;  %v1532_v53 = vmul.f32 %v4265_v21, %v4265_v21 }
 0x420   : > { %v2809_v11 = vpop.f32.mrf.mxu0 }
 0x421   : > { %v4274_v20 = vadd.f32 %v2809_v11, %v4262_v0  ;;  %v1530_v4 = vmul.f32 %v4271_v55, %v4271_v55  ;;  %v1564_v24 = vsel %vm1529_vm3, %v1532_v53, 0.0 }
 0x422   : > { %v1403_v47 = vpop.f32.mrf.mxu0  ;;  %v1600_v9 = vsel %vm400_vm1, %v1564_v24, 0.0 }
 0x423   : > { %v4282_v60 = vadd.f32 %v4262_v0, %v1403_v47  ;;  %v1562_v10 = vsel %vm1529_vm3, %v1530_v4, 0.0  ;;  %v1533_v7 = vmul.f32 %v4274_v20, %v4274_v20 }
 0x424   : > { %v1594_v32 = vsel %vm400_vm1, %v1562_v10, 0.0 }
 0x425   : > { %1595 = vadd.xlane.f32.xlu1 %v1594_v32  ;;  %v1531_v40 = vmul.f32 %v4282_v60, %v4282_v60  ;;  %v1565_v38 = vsel %vm1529_vm3, %v1533_v7, 0.0 }
 0x426   : > { %v1603_v54 = vsel %vm400_vm1, %v1565_v38, 0.0 }
 0x427   : > { %v1563_v31 = vsel %vm1529_vm3, %v1531_v40, 0.0 }
 0x428   : > { %v1597_v3 = vsel %vm400_vm1, %v1563_v31, 0.0 }
 0x429   : > { %1598 = vadd.xlane.f32.xlu0 %v1597_v3  ;;  %1601 = vadd.xlane.f32.xlu1 %v1600_v9 }
 0x42c   : > { %v2812_v13 = vpop.f32.mrf.mxu0 }
 0x42d   : > { %v4301_v23 = vadd.f32 %v2812_v13, %v4262_v0  ;;  %1604 = vadd.xlane.f32.xlu0 %v1603_v54 }
 0x42e   : > { %v1416_v52 = vpop.f32.mrf.mxu0 }
 0x42f   : > { %v4304_v14 = vadd.f32 %v4262_v0, %v1416_v52  ;;  %v1536_v18 = vmul.f32 %v4301_v23, %v4301_v23 }
 0x430   : > { %v2813_v29 = vpop.f32.mrf.mxu0 }
 0x431   : > { %v4307_v41 = vadd.f32 %v2813_v29, %v4262_v0  ;;  %v1534_v36 = vmul.f32 %v4304_v14, %v4304_v14  ;;  %v1568_v34 = vsel %vm1529_vm3, %v1536_v18, 0.0 }
 0x432   : > { %v1419_v62 = vpop.f32.mrf.mxu0  ;;  %v1612_v49 = vsel %vm400_vm1, %v1568_v34, 0.0 }
 0x433   : > { %v4314_v44 = vadd.f32 %v4262_v0, %v1419_v62  ;;  %v1566_v15 = vsel %vm1529_vm3, %v1534_v36, 0.0  ;;  %v1537_v26 = vmul.f32 %v4307_v41, %v4307_v41 }
 0x434   : > { %v1606_v25 = vsel %vm400_vm1, %v1566_v15, 0.0 }
 0x435   : > { %1607 = vadd.xlane.f32.xlu1 %v1606_v25  ;;  %v1535_v58 = vmul.f32 %v4314_v44, %v4314_v44  ;;  %v1569_v6 = vsel %vm1529_vm3, %v1537_v26, 0.0 }
 0x436   : > { %v1615_v16 = vsel %vm400_vm1, %v1569_v6, 0.0 }
 0x437   : > { %v1567_v35 = vsel %vm1529_vm3, %v1535_v58, 0.0 }
 0x438   : > { %v1609_v57 = vsel %vm400_vm1, %v1567_v35, 0.0 }
 0x439   : > { %1610 = vadd.xlane.f32.xlu0 %v1609_v57  ;;  %1613 = vadd.xlane.f32.xlu1 %v1612_v49 }
 0x43c   : > { %v2816_v30 = vpop.f32.mrf.mxu0 }
 0x43d   : > { %v4333_v28 = vadd.f32 %v2816_v30, %v4262_v0  ;;  %1616 = vadd.xlane.f32.xlu0 %v1615_v16 }
 0x43e   : > { %v1432_v33 = vpop.f32.mrf.mxu0 }
 0x43f   : > { %v4336_v5 = vadd.f32 %v4262_v0, %v1432_v33  ;;  %v1540_v63 = vmul.f32 %v4333_v28, %v4333_v28 }
 0x440   : > { %v2817_v46 = vpop.f32.mrf.mxu0 }
 0x441   : > { %v4339_v59 = vadd.f32 %v2817_v46, %v4262_v0  ;;  %v1538_v42 = vmul.f32 %v4336_v5, %v4336_v5  ;;  %v1572_v1 = vsel %vm1529_vm3, %v1540_v63, 0.0 }
 0x442   : > { %v1435_v2 = vpop.f32.mrf.mxu0  ;;  %v1624_v37 = vsel %vm400_vm1, %v1572_v1, 0.0 }
 0x443   : > { %v4346_v51 = vadd.f32 %v4262_v0, %v1435_v2  ;;  %v1570_v61 = vsel %vm1529_vm3, %v1538_v42, 0.0  ;;  %v1541_v56 = vmul.f32 %v4339_v59, %v4339_v59 }
 0x444   : > { %v1618_v43 = vsel %vm400_vm1, %v1570_v61, 0.0 }
 0x445   : > { %1619 = vadd.xlane.f32.xlu1 %v1618_v43  ;;  %v1539_v12 = vmul.f32 %v4346_v51, %v4346_v51  ;;  %v1573_v27 = vsel %vm1529_vm3, %v1541_v56, 0.0 }
 0x446   : > { %v1627_v39 = vsel %vm400_vm1, %v1573_v27, 0.0 }
 0x447   : > { %v1571_v48 = vsel %vm1529_vm3, %v1539_v12, 0.0 }
 0x448   : > { %v1621_v8 = vsel %vm400_vm1, %v1571_v48, 0.0 }
 0x449   : > { %1622 = vadd.xlane.f32.xlu0 %v1621_v8  ;;  %1625 = vadd.xlane.f32.xlu1 %v1624_v37 }
 0x44c   : > { %v2820_v22 = vpop.f32.mrf.mxu0 }
 0x44d   : > { %v4365_v45 = vadd.f32 %v2820_v22, %v4262_v0  ;;  %1628 = vadd.xlane.f32.xlu0 %v1627_v39 }
 0x44e   : > { %v1448_v19 = vpop.f32.mrf.mxu0 }
 0x44f   : > { %v4368_v11 = vadd.f32 %v4262_v0, %v1448_v19  ;;  %v1544_v10 = vmul.f32 %v4365_v45, %v4365_v45 }
 0x450   : > { %v2821_v4 = vpop.f32.mrf.mxu0 }
 0x451   : > { %v4371_v53 = vadd.f32 %v2821_v4, %v4262_v0  ;;  %v1542_v47 = vmul.f32 %v4368_v11, %v4368_v11  ;;  %v1576_v3 = vsel %vm1529_vm3, %v1544_v10, 0.0 }
 0x452   : > { %v1451_v32 = vpop.f32.mrf.mxu0  ;;  %v1636_v54 = vsel %vm400_vm1, %v1576_v3, 0.0 }
 0x453   : > { %v4378_v40 = vadd.f32 %v4262_v0, %v1451_v32  ;;  %v1574_v24 = vsel %vm1529_vm3, %v1542_v47, 0.0  ;;  %v1545_v9 = vmul.f32 %v4371_v53, %v4371_v53 }
 0x454   : > { %v1630_v7 = vsel %vm400_vm1, %v1574_v24, 0.0 }
 0x455   : > { %1631 = vadd.xlane.f32.xlu1 %v1630_v7  ;;  %v1543_v31 = vmul.f32 %v4378_v40, %v4378_v40  ;;  %v1577_v52 = vsel %vm1529_vm3, %v1545_v9, 0.0 }
 0x456   : > { %v1639_v36 = vsel %vm400_vm1, %v1577_v52, 0.0 }
 0x457   : > { %v1575_v38 = vsel %vm1529_vm3, %v1543_v31, 0.0 }
 0x458   : > { %v1633_v13 = vsel %vm400_vm1, %v1575_v38, 0.0 }
 0x459   : > { %1634 = vadd.xlane.f32.xlu0 %v1633_v13  ;;  %1637 = vadd.xlane.f32.xlu1 %v1636_v54 }
 0x45c   : > { %v2824_v29 = vpop.f32.mrf.mxu1 }
 0x45d   : > { %v4397_v18 = vadd.f32 %v2824_v29, %v4262_v0  ;;  %1640 = vadd.xlane.f32.xlu0 %v1639_v36 }
 0x45e   : > { %v1464_v62 = vpop.f32.mrf.mxu1 }
 0x45f   : > { %v4400_v15 = vadd.f32 %v4262_v0, %v1464_v62  ;;  %v1548_v26 = vmul.f32 %v4397_v18, %v4397_v18 }
 0x460   : > { %v2825_v25 = vpop.f32.mrf.mxu1 }
 0x461   : > { %v4403_v58 = vadd.f32 %v2825_v25, %v4262_v0  ;;  %v1546_v34 = vmul.f32 %v4400_v15, %v4400_v15  ;;  %v1580_v16 = vsel %vm1529_vm3, %v1548_v26, 0.0 }
 0x462   : > { %v1467_v35 = vpop.f32.mrf.mxu1  ;;  %v1648_v63 = vsel %vm400_vm1, %v1580_v16, 0.0 }
 0x463   : > { %v4410_v57 = vadd.f32 %v4262_v0, %v1467_v35  ;;  %v1578_v49 = vsel %vm1529_vm3, %v1546_v34, 0.0  ;;  %v1549_v33 = vmul.f32 %v4403_v58, %v4403_v58 }
 0x464   : > { %v1642_v6 = vsel %vm400_vm1, %v1578_v49, 0.0 }
 0x465   : > { %1643 = vadd.xlane.f32.xlu1 %v1642_v6  ;;  %v1547_v30 = vmul.f32 %v4410_v57, %v4410_v57  ;;  %v1581_v2 = vsel %vm1529_vm3, %v1549_v33, 0.0 }
 0x466   : > { %v1651_v43 = vsel %vm400_vm1, %v1581_v2, 0.0 }
 0x467   : > { %v1579_v46 = vsel %vm1529_vm3, %v1547_v30, 0.0 }
 0x468   : > { %v1645_v42 = vsel %vm400_vm1, %v1579_v46, 0.0 }
 0x469   : > { %1646 = vadd.xlane.f32.xlu0 %v1645_v42  ;;  %1649 = vadd.xlane.f32.xlu1 %v1648_v63 }
 0x46c   : > { %v2828_v61 = vpop.f32.mrf.mxu1 }
 0x46d   : > { %v4429_v12 = vadd.f32 %v2828_v61, %v4262_v0  ;;  %1652 = vadd.xlane.f32.xlu0 %v1651_v43 }
 0x46e   : > { %v1480_v1 = vpop.f32.mrf.mxu1 }
 0x46f   : > { %v4432_v56 = vadd.f32 %v4262_v0, %v1480_v1  ;;  %v1552_v27 = vmul.f32 %v4429_v12, %v4429_v12 }
 0x470   : > { %v2829_v48 = vpop.f32.mrf.mxu1 }
 0x471   : > { %v4435_v8 = vadd.f32 %v2829_v48, %v4262_v0  ;;  %v1550_v37 = vmul.f32 %v4432_v56, %v4432_v56  ;;  %v1584_v10 = vsel %vm1529_vm3, %v1552_v27, 0.0 }
 0x472   : > { %v1483_v22 = vpop.f32.mrf.mxu1  ;;  %v1660_v31 = vsel %vm400_vm1, %v1584_v10, 0.0 }
 0x473   : > { %v4442_v39 = vadd.f32 %v4262_v0, %v1483_v22  ;;  %v1582_v19 = vsel %vm1529_vm3, %v1550_v37, 0.0  ;;  %v1553_v32 = vmul.f32 %v4435_v8, %v4435_v8 }
 0x474   : > { %v1654_v4 = vsel %vm400_vm1, %v1582_v19, 0.0 }
 0x475   : > { %1655 = vadd.xlane.f32.xlu1 %v1654_v4  ;;  %v1551_v47 = vmul.f32 %v4442_v39, %v4442_v39  ;;  %v1585_v3 = vsel %vm1529_vm3, %v1553_v32, 0.0 }
 0x476   : > { %v1663_v38 = vsel %vm400_vm1, %v1585_v3, 0.0 }
 0x477   : > { %v1583_v24 = vsel %vm1529_vm3, %v1551_v47, 0.0 }
 0x478   : > { %v1657_v7 = vsel %vm400_vm1, %v1583_v24, 0.0 }
 0x479   : > { %1658 = vadd.xlane.f32.xlu0 %v1657_v7  ;;  %1661 = vadd.xlane.f32.xlu1 %v1660_v31 }
 0x47c   : > { %v2832_v9 = vpop.f32.mrf.mxu1 }
 0x47d   : > { %v4461_v13 = vadd.f32 %v2832_v9, %v4262_v0  ;;  %1664 = vadd.xlane.f32.xlu0 %v1663_v38 }
 0x47e   : > { %v1496_v54 = vpop.f32.mrf.mxu1 }
 0x47f   : > { %v4464_v52 = vadd.f32 %v4262_v0, %v1496_v54  ;;  %v1556_v25 = vmul.f32 %v4461_v13, %v4461_v13 }
 0x480   : > { %v2833_v29 = vpop.f32.mrf.mxu1 }
 0x481   : > { %v4467_v36 = vadd.f32 %v2833_v29, %v4262_v0  ;;  %v1554_v62 = vmul.f32 %v4464_v52, %v4464_v52  ;;  %v1588_v30 = vsel %vm1529_vm3, %v1556_v25, 0.0 }
 0x482   : > { %v1499_v34 = vpop.f32.mrf.mxu1  ;;  %v1672_v42 = vsel %vm400_vm1, %v1588_v30, 0.0 }
 0x483   : > { %v4474_v26 = vadd.f32 %v4262_v0, %v1499_v34  ;;  %v1586_v35 = vsel %vm1529_vm3, %v1554_v62, 0.0  ;;  %v1557_v16 = vmul.f32 %v4467_v36, %v4467_v36 }
 0x484   : > { %v1666_v49 = vsel %vm400_vm1, %v1586_v35, 0.0 }
 0x485   : > { %1667 = vadd.xlane.f32.xlu1 %v1666_v49  ;;  %v1555_v6 = vmul.f32 %v4474_v26, %v4474_v26  ;;  %v1589_v63 = vsel %vm1529_vm3, %v1557_v16, 0.0 }
 0x486   : > { %v1675_v61 = vsel %vm400_vm1, %v1589_v63, 0.0 }
 0x487   : > { %v1587_v33 = vsel %vm1529_vm3, %v1555_v6, 0.0 }
 0x488   : > { %v1669_v46 = vsel %vm400_vm1, %v1587_v33, 0.0 }
 0x489   : > { %1670 = vadd.xlane.f32.xlu0 %v1669_v46  ;;  %1673 = vadd.xlane.f32.xlu1 %v1672_v42  ;;  %v1786_v46 = vsub.f32 0.0, %v4271_v55 }
 0x48c   : > { %v2836_v2 = vpop.f32.mrf.mxu1 }
 0x48d   : > { %v4493_v43 = vadd.f32 %v2836_v2, %v4262_v0  ;;  %1676 = vadd.xlane.f32.xlu0 %v1675_v61 }
 0x48e   : > { %v1512_v1 = vpop.f32.mrf.mxu1 }
 0x48f   : > { %v4496_v48 = vadd.f32 %v4262_v0, %v1512_v1  ;;  %v1560_v19 = vmul.f32 %v4493_v43, %v4493_v43 }
 0x490   : > { %v2837_v37 = vpop.f32.mrf.mxu1 }
 0x491   : > { %v4499_v27 = vadd.f32 %v2837_v37, %v4262_v0  ;;  %v1558_v22 = vmul.f32 %v4496_v48, %v4496_v48  ;;  %v1592_v7 = vsel %vm1529_vm3, %v1560_v19, 0.0  ;;  %v1787_v19 = vsub.f32 0.0, %v4282_v60 }
 0x492   : > { %v1515_v4 = vpop.f32.mrf.mxu1  ;;  %v1684_v9 = vsel %vm400_vm1, %v1592_v7, 0.0 }
 0x493   : > { %v4506_v47 = vadd.f32 %v4262_v0, %v1515_v4  ;;  %v1590_v10 = vsel %vm1529_vm3, %v1558_v22, 0.0  ;;  %v1561_v31 = vmul.f32 %v4499_v27, %v4499_v27 }
 0x494   : > { %v1678_v32 = vsel %vm400_vm1, %v1590_v10, 0.0 }
 0x495   : > { %1679 = vadd.xlane.f32.xlu1 %v1678_v32  ;;  %v1559_v24 = vmul.f32 %v4506_v47, %v4506_v47  ;;  %v1593_v38 = vsel %vm1529_vm3, %v1561_v31, 0.0 }
 0x496   : > { %v1687_v54 = vsel %vm400_vm1, %v1593_v38, 0.0  ;;  %v1789_v38 = vsub.f32 0.0, %v4274_v20 }
 0x497   : > { %v1591_v0 = vsel %vm1529_vm3, %v1559_v24, 0.0 }
 0x498   : > { %v1681_v3 = vsel %vm400_vm1, %v1591_v0, 0.0 }
 0x499   : > { %1682 = vadd.xlane.f32.xlu0 %v1681_v3  ;;  %1685 = vadd.xlane.f32.xlu1 %v1684_v9 }
 0x49d   : > { %1688 = vadd.xlane.f32.xlu0 %v1687_v54 }
 0x4ae   : > { %v1596_v29 = vpop.xlane.xlu1 %1595 }
 0x4af   : > { %v1690_v62 = vmax.f32 %v1596_v29, 1e-24 }
 0x4b1   : > { %3068 = vrsqrt.f32 %v1690_v62 }
 0x4b2   : > { %v1599_v25 = vpop.xlane.xlu0 %1598  ;;  %v1602_v34 = vpop.xlane.xlu1 %1601 }
 0x4b3   : > { %v1691_v35 = vmax.f32 %v1599_v25, 1e-24  ;;  %v1692_v49 = vmax.f32 %v1602_v34, 1e-24 }
 0x4b5   : > { %3070 = vrsqrt.f32 %v1691_v35 }
 0x4b6   : > { %3072 = vrsqrt.f32 %v1692_v49  ;;  %v1605_v6 = vpop.xlane.xlu0 %1604 }
 0x4b7   : > { %v1693_v30 = vmax.f32 %v1605_v6, 1e-24  ;;  %v1790_v6 = vsub.f32 0.0, %v4304_v14 }
 0x4b9   : > { %3074 = vrsqrt.f32 %v1693_v30 }
 0x4be   : > { %v3069_v16 = vpop.eup %3068  ;;  %v1608_v33 = vpop.xlane.xlu1 %1607 }
 0x4bf   : > { %v1754_v42 = vmul.f32 %v3069_v16, %v4271_v55  ;;  %v1694_v63 = vmax.f32 %v1608_v33, 1e-24  ;;  %v1788_v55 = vsub.f32 0.0, %v4265_v21 }
 0x4c1   : > { %v1818_v2 = vsel %vm1529_vm3, %v1754_v42, %v1786_v46  ;;  %3076 = vrsqrt.f32 %v1694_v63  ;;  %v1882_v7 = vsel %vm1529_vm3, %v1754_v42, 0.0 }
 0x4c2   : > { %v3071_v61 = vpop.eup %3070  ;;  %1850 = vst.msk [vmem:[%s4529_s24] sm:$0xff] %vm400_vm1, %v1818_v2  ;;  %v1611_v1 = vpop.xlane.xlu0 %1610 }
 0x4c3   : > { %v1614_v37 = vpop.xlane.xlu1 %1613  ;;  %v3073_v22 = vpop.eup %3072  ;;  %v1755_v4 = vmul.f32 %v3071_v61, %v4282_v60  ;;  %v1695_v10 = vmax.f32 %v1611_v1, 1e-24  ;;  %v1791_v61 = vsub.f32 0.0, %v4314_v44 }
 0x4c4   : > { %v1696_v32 = vmax.f32 %v1614_v37, 1e-24  ;;  %v1756_v24 = vmul.f32 %v3073_v22, %v4265_v21  ;;  %v1792_v22 = vsub.f32 0.0, %v4301_v23 }
 0x4c5   : > { %v1819_v31 = vsel %vm1529_vm3, %v1755_v4, %v1787_v19  ;;  %v1883_v0 = vsel %vm1529_vm3, %v1755_v4, 0.0  ;;  %3078 = vrsqrt.f32 %v1695_v10 }
 0x4c6   : > { %v3075_v3 = vpop.eup %3074  ;;  %1851 = vst.msk [vmem:[%s4529_s24 + $0x8] sm:$0xff] %vm400_vm1, %v1819_v31  ;;  %3080 = vrsqrt.f32 %v1696_v32  ;;  %v1617_v60 = vpop.xlane.xlu0 %1616  ;;  %v1914_v9 = vpack.c.bf16 %v1883_v0, %v1882_v7  ;;  %v1820_v21 = vsel %vm1529_vm3, %v1756_v24, %v1788_v55  ;;  %v1884_v34 = vsel %vm1529_vm3, %v1756_v24, 0.0 }
 0x4c7   : > { %v1697_v54 = vmax.f32 %v1617_v60, 1e-24  ;;  %v1757_v29 = vmul.f32 %v3075_v3, %v4274_v20  ;;  %1852 = vst.msk [vmem:[%s4529_s24 + $0x10] sm:$0xff] %vm400_vm1, %v1820_v21  ;;  %v1793_v7 = vsub.f32 0.0, %v4307_v41 }
 0x4c8   : > { %2640 = vmatmul.mubr.msk.bf16.vlgmr.msra.gmra.mxu0 %vm400_vm1, %v1914_v9 }
 0x4c9   : > { %3082 = vrsqrt.f32 %v1697_v54  ;;  %2020 = vmatprep.mubr.bf16.mxu0 %v5244_v17  ;;  %v1821_v62 = vsel %vm1529_vm3, %v1757_v29, %v1789_v38  ;;  %v1885_v25 = vsel %vm1529_vm3, %v1757_v29, 0.0  ;;  %v1794_v54 = vsub.f32 0.0, %v4336_v5 }
 0x4ca   : > { %1853 = vst.msk [vmem:[%s4529_s24 + $0x18] sm:$0xff] %vm400_vm1, %v1821_v62  ;;  %v1915_v49 = vpack.c.bf16 %v1885_v25, %v1884_v34 }
 0x4ce   : > { %v3077_v20 = vpop.eup %3076  ;;  %v1620_v35 = vpop.xlane.xlu1 %1619 }
 0x4cf   : > { %v1698_v30 = vmax.f32 %v1620_v35, 1e-24  ;;  %v1758_v16 = vmul.f32 %v3077_v20, %v4304_v14 }
 0x4d0   : > { %2641 = vmatmul.mubr.msk.bf16.gmra.mxu0 %vm400_vm1, %v1915_v49 }
 0x4d1   : > { %3084 = vrsqrt.f32 %v1698_v30  ;;  %2030 = vmatprep.mubr.bf16.mxu0 %v5244_v17  ;;  %v1822_v33 = vsel %vm1529_vm3, %v1758_v16, %v1790_v6  ;;  %v1886_v10 = vsel %vm1529_vm3, %v1758_v16, 0.0  ;;  %v1795_v6 = vsub.f32 0.0, %v4346_v51 }
 0x4d2   : > { %v3079_v46 = vpop.eup %3078  ;;  %v1623_v42 = vpop.xlane.xlu0 %1622  ;;  %1854 = vst.msk [vmem:[%s4529_s24 + $0x20] sm:$0xff] %vm400_vm1, %v1822_v33  ;;  %v1796_v33 = vsub.f32 0.0, %v4333_v28 }
 0x4d3   : > { %v1626_v63 = vpop.xlane.xlu1 %1625  ;;  %v3081_v2 = vpop.eup %3080  ;;  %v1699_v1 = vmax.f32 %v1623_v42, 1e-24  ;;  %v1759_v14 = vmul.f32 %v3079_v46, %v4314_v44 }
 0x4d4   : > { %v1700_v37 = vmax.f32 %v1626_v63, 1e-24  ;;  %v1760_v19 = vmul.f32 %v3081_v2, %v4301_v23 }
 0x4d5   : > { %3086 = vrsqrt.f32 %v1699_v1  ;;  %v1823_v4 = vsel %vm1529_vm3, %v1759_v14, %v1791_v61  ;;  %v1887_v32 = vsel %vm1529_vm3, %v1759_v14, 0.0 }
 0x4d6   : > { %v3083_v55 = vpop.eup %3082  ;;  %3088 = vrsqrt.f32 %v1700_v37  ;;  %v1629_v24 = vpop.xlane.xlu0 %1628  ;;  %1855 = vst.msk [vmem:[%s4529_s24 + $0x28] sm:$0xff] %vm400_vm1, %v1823_v4  ;;  %v1916_v44 = vpack.c.bf16 %v1887_v32, %v1886_v10  ;;  %v1824_v23 = vsel %vm1529_vm3, %v1760_v19, %v1792_v22  ;;  %v1888_v9 = vsel %vm1529_vm3, %v1760_v19, 0.0 }
 0x4d7   : > { %v1701_v31 = vmax.f32 %v1629_v24, 1e-24  ;;  %v1761_v0 = vmul.f32 %v3083_v55, %v4307_v41  ;;  %1856 = vst.msk [vmem:[%s4529_s24 + $0x30] sm:$0xff] %vm400_vm1, %v1824_v23  ;;  %v1797_v37 = vsub.f32 0.0, %v4339_v59  ;;  %v1798_v24 = vsub.f32 0.0, %v4368_v11 }
 0x4d8   : > { %2642 = vmatmul.mubr.msk.bf16.gmra.mxu0 %vm400_vm1, %v1916_v44 }
 0x4d9   : > { %3090 = vrsqrt.f32 %v1701_v31  ;;  %2040 = vmatprep.mubr.bf16.mxu0 %v5244_v17  ;;  %v1825_v3 = vsel %vm1529_vm3, %v1761_v0, %v1793_v7  ;;  %v1889_v60 = vsel %vm1529_vm3, %v1761_v0, 0.0 }
 0x4da   : > { %1857 = vst.msk [vmem:[%s4529_s24 + $0x38] sm:$0xff] %vm400_vm1, %v1825_v3  ;;  %v1917_v38 = vpack.c.bf16 %v1889_v60, %v1888_v9  ;;  %v1799_v9 = vsub.f32 0.0, %v4378_v40 }
 0x4de   : > { %v3085_v41 = vpop.eup %3084  ;;  %v1632_v21 = vpop.xlane.xlu1 %1631 }
 0x4df   : > { %v1702_v29 = vmax.f32 %v1632_v21, 1e-24  ;;  %v1762_v62 = vmul.f32 %v3085_v41, %v4336_v5 }
 0x4e0   : > { %2643 = vmatmul.mubr.msk.bf16.gmra.mxu0 %vm400_vm1, %v1917_v38  ;;  %v1800_v38 = vsub.f32 0.0, %v4365_v45 }
 0x4e1   : > { %3092 = vrsqrt.f32 %v1702_v29  ;;  %2050 = vmatprep.mubr.bf16.mxu0 %v5244_v17  ;;  %v1826_v25 = vsel %vm1529_vm3, %v1762_v62, %v1794_v54  ;;  %v1890_v63 = vsel %vm1529_vm3, %v1762_v62, 0.0 }
 0x4e2   : > { %v3087_v34 = vpop.eup %3086  ;;  %v1635_v20 = vpop.xlane.xlu0 %1634  ;;  %1858 = vst.msk [vmem:[%s4529_s24 + $0x40] sm:$0xff] %vm400_vm1, %v1826_v25 }
 0x4e3   : > { %v1638_v35 = vpop.xlane.xlu1 %1637  ;;  %v3089_v49 = vpop.eup %3088  ;;  %v1703_v30 = vmax.f32 %v1635_v20, 1e-24  ;;  %v1763_v5 = vmul.f32 %v3087_v34, %v4346_v51 }
 0x4e4   : > { %v1704_v16 = vmax.f32 %v1638_v35, 1e-24  ;;  %v1764_v46 = vmul.f32 %v3089_v49, %v4333_v28  ;;  %v1801_v35 = vsub.f32 0.0, %v4371_v53 }
 0x4e5   : > { %3094 = vrsqrt.f32 %v1703_v30  ;;  %v1827_v42 = vsel %vm1529_vm3, %v1763_v5, %v1795_v6  ;;  %v1891_v2 = vsel %vm1529_vm3, %v1763_v5, 0.0 }
 0x4e6   : > { %v3091_v61 = vpop.eup %3090  ;;  %3096 = vrsqrt.f32 %v1704_v16  ;;  %v1641_v1 = vpop.xlane.xlu0 %1640  ;;  %1859 = vst.msk [vmem:[%s4529_s24 + $0x48] sm:$0xff] %vm400_vm1, %v1827_v42  ;;  %v1918_v51 = vpack.c.bf16 %v1891_v2, %v1890_v63  ;;  %v1828_v28 = vsel %vm1529_vm3, %v1764_v46, %v1796_v33  ;;  %v1892_v10 = vsel %vm1529_vm3, %v1764_v46, 0.0 }
 0x4e7   : > { %v1705_v14 = vmax.f32 %v1641_v1, 1e-24  ;;  %v1765_v22 = vmul.f32 %v3091_v61, %v4339_v59  ;;  %1860 = vst.msk [vmem:[%s4529_s24 + $0x50] sm:$0xff] %vm400_vm1, %v1828_v28  ;;  %v1802_v42 = vsub.f32 0.0, %v4400_v15 }
 0x4e8   : > { %2644 = vmatmul.mubr.msk.bf16.gmra.mxu0 %vm400_vm1, %v1918_v51 }
 0x4e9   : > { %3098 = vrsqrt.f32 %v1705_v14  ;;  %2060 = vmatprep.mubr.bf16.mxu0 %v5244_v17  ;;  %v1829_v19 = vsel %vm1529_vm3, %v1765_v22, %v1797_v37  ;;  %v1893_v4 = vsel %vm1529_vm3, %v1765_v22, 0.0  ;;  %v1803_v14 = vsub.f32 0.0, %v4410_v57 }
 0x4ea   : > { %1861 = vst.msk [vmem:[%s4529_s24 + $0x58] sm:$0xff] %vm400_vm1, %v1829_v19  ;;  %v1919_v55 = vpack.c.bf16 %v1893_v4, %v1892_v10  ;;  %v1804_v4 = vsub.f32 0.0, %v4397_v18 }
 0x4ee   : > { %v3093_v59 = vpop.eup %3092  ;;  %v1644_v32 = vpop.xlane.xlu1 %1643 }
 0x4ef   : > { %v1706_v44 = vmax.f32 %v1644_v32, 1e-24  ;;  %v1766_v23 = vmul.f32 %v3093_v59, %v4368_v11 }
 0x4f0   : > { %2645 = vmatmul.mubr.msk.bf16.gmra.mxu0 %vm400_vm1, %v1919_v55 }
 0x4f1   : > { %3100 = vrsqrt.f32 %v1706_v44  ;;  %2070 = vmatprep.mubr.bf16.mxu0 %v5244_v17  ;;  %v1830_v7 = vsel %vm1529_vm3, %v1766_v23, %v1798_v24  ;;  %v1894_v62 = vsel %vm1529_vm3, %v1766_v23, 0.0  ;;  %v1805_v23 = vsub.f32 0.0, %v4403_v58 }
 0x4f2   : > { %v3095_v31 = vpop.eup %3094  ;;  %v1647_v0 = vpop.xlane.xlu0 %1646  ;;  %1862 = vst.msk [vmem:[%s4529_s24 + $0x60] sm:$0xff] %vm400_vm1, %v1830_v7 }
 0x4f3   : > { %v1650_v3 = vpop.xlane.xlu1 %1649  ;;  %v3097_v60 = vpop.eup %3096  ;;  %v1707_v41 = vmax.f32 %v1647_v0, 1e-24  ;;  %v1767_v11 = vmul.f32 %v3095_v31, %v4378_v40 }
 0x4f4   : > { %v1708_v21 = vmax.f32 %v1650_v3, 1e-24  ;;  %v1768_v54 = vmul.f32 %v3097_v60, %v4365_v45 }
 0x4f5   : > { %3102 = vrsqrt.f32 %v1707_v41  ;;  %v1831_v29 = vsel %vm1529_vm3, %v1767_v11, %v1799_v9  ;;  %v1895_v25 = vsel %vm1529_vm3, %v1767_v11, 0.0 }
 0x4f6   : > { %v3099_v34 = vpop.eup %3098  ;;  %3104 = vrsqrt.f32 %v1708_v21  ;;  %v1653_v20 = vpop.xlane.xlu0 %1652  ;;  %1863 = vst.msk [vmem:[%s4529_s24 + $0x68] sm:$0xff] %vm400_vm1, %v1831_v29  ;;  %v1920_v40 = vpack.c.bf16 %v1895_v25, %v1894_v62  ;;  %v1832_v45 = vsel %vm1529_vm3, %v1768_v54, %v1800_v38  ;;  %v1896_v5 = vsel %vm1529_vm3, %v1768_v54, 0.0 }
 0x4f7   : > { %v1709_v49 = vmax.f32 %v1653_v20, 1e-24  ;;  %v1769_v6 = vmul.f32 %v3099_v34, %v4371_v53  ;;  %1864 = vst.msk [vmem:[%s4529_s24 + $0x70] sm:$0xff] %vm400_vm1, %v1832_v45  ;;  %v1806_v21 = vsub.f32 0.0, %v4432_v56  ;;  %v1807_v20 = vsub.f32 0.0, %v4442_v39 }
 0x4f8   : > { %2646 = vmatmul.mubr.msk.bf16.gmra.mxu0 %vm400_vm1, %v1920_v40 }
 0x4f9   : > { %3106 = vrsqrt.f32 %v1709_v49  ;;  %2080 = vmatprep.mubr.bf16.mxu0 %v5244_v17  ;;  %v1833_v30 = vsel %vm1529_vm3, %v1769_v6, %v1801_v35  ;;  %v1897_v16 = vsel %vm1529_vm3, %v1769_v6, 0.0  ;;  %v1808_v35 = vsub.f32 0.0, %v4429_v12 }
 0x4fa   : > { %1865 = vst.msk [vmem:[%s4529_s24 + $0x78] sm:$0xff] %vm400_vm1, %v1833_v30  ;;  %v1921_v46 = vpack.c.bf16 %v1897_v16, %v1896_v5 }
 0x4fe   : > { %v3101_v53 = vpop.eup %3100  ;;  %v1656_v33 = vpop.xlane.xlu1 %1655 }
 0x4ff   : > { %v1710_v63 = vmax.f32 %v1656_v33, 1e-24  ;;  %v1770_v2 = vmul.f32 %v3101_v53, %v4400_v15  ;;  %v1809_v33 = vsub.f32 0.0, %v4435_v8 }
 0x500   : > { %2647 = vmatmul.mubr.msk.bf16.gmra.mxu0 %vm400_vm1, %v1921_v46 }
 0x501   : > { %3108 = vrsqrt.f32 %v1710_v63  ;;  %2090 = vmatprep.mubr.bf16.mxu0 %v5244_v17  ;;  %v1834_v61 = vsel %vm1529_vm3, %v1770_v2, %v1802_v42  ;;  %v1898_v32 = vsel %vm1529_vm3, %v1770_v2, 0.0 }
 0x502   : > { %v3103_v1 = vpop.eup %3102  ;;  %v1659_v51 = vpop.xlane.xlu0 %1658  ;;  %1866 = vst.msk [vmem:[%s4529_s24 + $0x80] sm:$0xff] %vm400_vm1, %v1834_v61 }
 0x503   : > { %v1662_v28 = vpop.xlane.xlu1 %1661  ;;  %v3105_v37 = vpop.eup %3104  ;;  %v1711_v22 = vmax.f32 %v1659_v51, 1e-24  ;;  %v1771_v15 = vmul.f32 %v3103_v1, %v4410_v57 }
 0x504   : > { %v1712_v19 = vmax.f32 %v1662_v28, 1e-24  ;;  %v1772_v10 = vmul.f32 %v3105_v37, %v4397_v18  ;;  %v1810_v28 = vsub.f32 0.0, %v4464_v52 }
 0x505   : > { %3110 = vrsqrt.f32 %v1711_v22  ;;  %v1835_v59 = vsel %vm1529_vm3, %v1771_v15, %v1803_v14  ;;  %v1899_v55 = vsel %vm1529_vm3, %v1771_v15, 0.0 }
 0x506   : > { %v3107_v24 = vpop.eup %3106  ;;  %3112 = vrsqrt.f32 %v1712_v19  ;;  %v1665_v44 = vpop.xlane.xlu0 %1664  ;;  %1867 = vst.msk [vmem:[%s4529_s24 + $0x88] sm:$0xff] %vm400_vm1, %v1835_v59  ;;  %v1922_v57 = vpack.c.bf16 %v1899_v55, %v1898_v32  ;;  %v1836_v18 = vsel %vm1529_vm3, %v1772_v10, %v1804_v4  ;;  %v1900_v60 = vsel %vm1529_vm3, %v1772_v10, 0.0 }
 0x507   : > { %v1713_v7 = vmax.f32 %v1665_v44, 1e-24  ;;  %v1773_v31 = vmul.f32 %v3107_v24, %v4403_v58  ;;  %1868 = vst.msk [vmem:[%s4529_s24 + $0x90] sm:$0xff] %vm400_vm1, %v1836_v18  ;;  %v1811_v59 = vsub.f32 0.0, %v4474_v26  ;;  %v1812_v24 = vsub.f32 0.0, %v4461_v13 }
 0x508   : > { %2648 = vmatmul.mubr.msk.bf16.gmra.mxu0 %vm400_vm1, %v1922_v57 }
 0x509   : > { %3114 = vrsqrt.f32 %v1713_v7  ;;  %2100 = vmatprep.mubr.bf16.mxu0 %v5244_v17  ;;  %v1837_v0 = vsel %vm1529_vm3, %v1773_v31, %v1805_v23  ;;  %v1901_v3 = vsel %vm1529_vm3, %v1773_v31, 0.0 }
 0x50a   : > { %1869 = vst.msk [vmem:[%s4529_s24 + $0x98] sm:$0xff] %vm400_vm1, %v1837_v0  ;;  %v1923_v41 = vpack.c.bf16 %v1901_v3, %v1900_v60  ;;  %v1813_v0 = vsub.f32 0.0, %v4467_v36 }
 0x50e   : > { %v3109_v58 = vpop.eup %3108  ;;  %v1668_v9 = vpop.xlane.xlu1 %1667 }
 0x50f   : > { %v1714_v11 = vmax.f32 %v1668_v9, 1e-24  ;;  %v1774_v38 = vmul.f32 %v3109_v58, %v4432_v56 }
 0x510   : > { %2649 = vmatmul.mubr.msk.bf16.gmra.mxu0 %vm400_vm1, %v1923_v41 }
 0x511   : > { %3116 = vrsqrt.f32 %v1714_v11  ;;  %2110 = vmatprep.mubr.bf16.mxu0 %v5244_v17  ;;  %v1838_v54 = vsel %vm1529_vm3, %v1774_v38, %v1806_v21  ;;  %v1902_v30 = vsel %vm1529_vm3, %v1774_v38, 0.0  ;;  %v1814_v11 = vsub.f32 0.0, %v4496_v48 }
 0x512   : > { %v3111_v29 = vpop.eup %3110  ;;  %v1671_v62 = vpop.xlane.xlu0 %1670  ;;  %1870 = vst.msk [vmem:[%s4529_s24 + $0xa0] sm:$0xff] %vm400_vm1, %v1838_v54 }
 0x513   : > { %v1674_v25 = vpop.xlane.xlu1 %1673  ;;  %v3113_v34 = vpop.eup %3112  ;;  %v1715_v40 = vmax.f32 %v1671_v62, 1e-24  ;;  %v1775_v56 = vmul.f32 %v3111_v29, %v4442_v39 }
 0x514   : > { %v1716_v45 = vmax.f32 %v1674_v25, 1e-24  ;;  %v1776_v49 = vmul.f32 %v3113_v34, %v4429_v12  ;;  %v1815_v25 = vsub.f32 0.0, %v4506_v47 }
 0x515   : > { %3118 = vrsqrt.f32 %v1715_v40  ;;  %v1839_v6 = vsel %vm1529_vm3, %v1775_v56, %v1807_v20  ;;  %v1903_v16 = vsel %vm1529_vm3, %v1775_v56, 0.0  ;;  %v1816_v20 = vsub.f32 0.0, %v4493_v43 }
 0x516   : > { %v3115_v5 = vpop.eup %3114  ;;  %3120 = vrsqrt.f32 %v1716_v45  ;;  %v1677_v53 = vpop.xlane.xlu0 %1676  ;;  %1871 = vst.msk [vmem:[%s4529_s24 + $0xa8] sm:$0xff] %vm400_vm1, %v1839_v6  ;;  %v1924_v39 = vpack.c.bf16 %v1903_v16, %v1902_v30  ;;  %v1840_v12 = vsel %vm1529_vm3, %v1776_v49, %v1808_v35  ;;  %v1904_v61 = vsel %vm1529_vm3, %v1776_v49, 0.0 }
 0x517   : > { %v1717_v46 = vmax.f32 %v1677_v53, 1e-24  ;;  %v1777_v42 = vmul.f32 %v3115_v5, %v4435_v8  ;;  %1872 = vst.msk [vmem:[%s4529_s24 + $0xb0] sm:$0xff] %vm400_vm1, %v1840_v12  ;;  %v1817_v6 = vsub.f32 0.0, %v4499_v27 }
 0x518   : > { %2650 = vmatmul.mubr.msk.bf16.gmra.mxu0 %vm400_vm1, %v1924_v39 }
 0x519   : > { %3122 = vrsqrt.f32 %v1717_v46  ;;  %2120 = vmatprep.mubr.bf16.mxu0 %v5244_v17  ;;  %v1841_v63 = vsel %vm1529_vm3, %v1777_v42, %v1809_v33  ;;  %v1905_v2 = vsel %vm1529_vm3, %v1777_v42, 0.0 }
 0x51a   : > { %1873 = vst.msk [vmem:[%s4529_s24 + $0xb8] sm:$0xff] %vm400_vm1, %v1841_v63  ;;  %v1925_v51 = vpack.c.bf16 %v1905_v2, %v1904_v61 }
 0x51e   : > { %v3117_v8 = vpop.eup %3116  ;;  %v1680_v1 = vpop.xlane.xlu1 %1679 }
 0x51f   : > { %v1718_v37 = vmax.f32 %v1680_v1, 1e-24  ;;  %v1778_v14 = vmul.f32 %v3117_v8, %v4464_v52 }
 0x520   : > { %2651 = vmatmul.mubr.msk.bf16.gmra.mxu0 %vm400_vm1, %v1925_v51 }
 0x521   : > { %3124 = vrsqrt.f32 %v1718_v37  ;;  %2130 = vmatprep.mubr.bf16.mxu0 %v5244_v17  ;;  %v1842_v22 = vsel %vm1529_vm3, %v1778_v14, %v1810_v28  ;;  %v1906_v18 = vsel %vm1529_vm3, %v1778_v14, 0.0 }
 0x522   : > { %v3119_v19 = vpop.eup %3118  ;;  %v1683_v15 = vpop.xlane.xlu0 %1682  ;;  %1874 = vst.msk [vmem:[%s4529_s24 + $0xc0] sm:$0xff] %vm400_vm1, %v1842_v22 }
 0x523   : > { %v1686_v4 = vpop.xlane.xlu1 %1685  ;;  %v3121_v10 = vpop.eup %3120  ;;  %v1719_v32 = vmax.f32 %v1683_v15, 1e-24  ;;  %v1779_v52 = vmul.f32 %v3119_v19, %v4474_v26 }
 0x524   : > { %v1720_v55 = vmax.f32 %v1686_v4, 1e-24  ;;  %v1780_v44 = vmul.f32 %v3121_v10, %v4461_v13 }
 0x525   : > { %3126 = vrsqrt.f32 %v1719_v32  ;;  %v1843_v57 = vsel %vm1529_vm3, %v1779_v52, %v1811_v59  ;;  %v1907_v23 = vsel %vm1529_vm3, %v1779_v52, 0.0 }
 0x526   : > { %v3123_v7 = vpop.eup %3122  ;;  %3128 = vrsqrt.f32 %v1720_v55  ;;  %v1689_v31 = vpop.xlane.xlu0 %1688  ;;  %1875 = vst.msk [vmem:[%s4529_s24 + $0xc8] sm:$0xff] %vm400_vm1, %v1843_v57  ;;  %v1926_v26 = vpack.c.bf16 %v1907_v23, %v1906_v18  ;;  %v1844_v13 = vsel %vm1529_vm3, %v1780_v44, %v1812_v24  ;;  %v1908_v41 = vsel %vm1529_vm3, %v1780_v44, 0.0 }
 0x527   : > { %v1721_v3 = vmax.f32 %v1689_v31, 1e-24  ;;  %v1781_v60 = vmul.f32 %v3123_v7, %v4467_v36  ;;  %1876 = vst.msk [vmem:[%s4529_s24 + $0xd0] sm:$0xff] %vm400_vm1, %v1844_v13 }
 0x528   : > { %2652 = vmatmul.mubr.msk.bf16.gmra.mxu0 %vm400_vm1, %v1926_v26 }
 0x529   : > { %3130 = vrsqrt.f32 %v1721_v3  ;;  %2140 = vmatprep.mubr.bf16.mxu0 %v5244_v17  ;;  %v1845_v58 = vsel %vm1529_vm3, %v1781_v60, %v1813_v0  ;;  %v1909_v9 = vsel %vm1529_vm3, %v1781_v60, 0.0 }
 0x52a   : > { %1877 = vst.msk [vmem:[%s4529_s24 + $0xd8] sm:$0xff] %vm400_vm1, %v1845_v58  ;;  %v1927_v21 = vpack.c.bf16 %v1909_v9, %v1908_v41 }
 0x52e   : > { %v3125_v36 = vpop.eup %3124 }
 0x52f   : > { %v1782_v38 = vmul.f32 %v3125_v36, %v4496_v48 }
 0x530   : > { %2653 = vmatmul.mubr.msk.bf16.gmra.mxu0 %vm400_vm1, %v1927_v21 }
 0x531   : > { %2150 = vmatprep.mubr.bf16.mxu0 %v5244_v17  ;;  %v1846_v54 = vsel %vm1529_vm3, %v1782_v38, %v1814_v11  ;;  %v1910_v45 = vsel %vm1529_vm3, %v1782_v38, 0.0 }
 0x532   : > { %v3127_v29 = vpop.eup %3126  ;;  %1878 = vst.msk [vmem:[%s4529_s24 + $0xe0] sm:$0xff] %vm400_vm1, %v1846_v54 }
 0x533   : > { %v3129_v62 = vpop.eup %3128  ;;  %v1783_v34 = vmul.f32 %v3127_v29, %v4506_v47 }
 0x534   : > { %v1784_v48 = vmul.f32 %v3129_v62, %v4493_v43 }
 0x535   : > { %v1847_v40 = vsel %vm1529_vm3, %v1783_v34, %v1815_v25  ;;  %v1911_v56 = vsel %vm1529_vm3, %v1783_v34, 0.0 }
 0x536   : > { %v3131_v35 = vpop.eup %3130  ;;  %1879 = vst.msk [vmem:[%s4529_s24 + $0xe8] sm:$0xff] %vm400_vm1, %v1847_v40  ;;  %v1928_v49 = vpack.c.bf16 %v1911_v56, %v1910_v45  ;;  %v1848_v47 = vsel %vm1529_vm3, %v1784_v48, %v1816_v20  ;;  %v1912_v5 = vsel %vm1529_vm3, %v1784_v48, 0.0 }
 0x537   : > { %v1785_v43 = vmul.f32 %v3131_v35, %v4499_v27  ;;  %1880 = vst.msk [vmem:[%s4529_s24 + $0xf0] sm:$0xff] %vm400_vm1, %v1848_v47 }
 0x538   : > { %2654 = vmatmul.mubr.msk.bf16.gmra.mxu0 %vm400_vm1, %v1928_v49 }
 0x539   : > { %2160 = vmatprep.mubr.bf16.mxu0 %v5244_v17  ;;  %v1849_v30 = vsel %vm1529_vm3, %v1785_v43, %v1817_v6  ;;  %v1913_v16 = vsel %vm1529_vm3, %v1785_v43, 0.0 }
 0x53a   : > { %1881 = vst.msk [vmem:[%s4529_s24 + $0xf8] sm:$0xff] %vm400_vm1, %v1849_v30  ;;  %v1929_v53 = vpack.c.bf16 %v1913_v16, %v1912_v5 }
 0x540   : > { %2655 = vmatmul.mubr.msk.bf16.gmra.mxu0 %vm400_vm1, %v1929_v53 }
 0x588   : > { %v2012_v27 = vpop.f32.mrf.mxu0 }
 0x589   : > { %v2171_v57 = vmul.f32 1.442695, %v2012_v27 }
 0x58a   : > { %v2014_v39 = vpop.f32.mrf.mxu0 }
 0x58b   : > { %v2173_v23 = vmul.f32 1.442695, %v2014_v39  ;;  %3132 = vpow2.f32 %v2171_v57 }
 0x58c   : > { %v2016_v12 = vpop.f32.mrf.mxu0 }
 0x58d   : > { %v2175_v7 = vmul.f32 1.442695, %v2016_v12  ;;  %3134 = vpow2.f32 %v2173_v23 }
 0x58e   : > { %v2018_v33 = vpop.f32.mrf.mxu0 }
 0x58f   : > { %v2177_v26 = vmul.f32 1.442695, %v2018_v33  ;;  %3136 = vpow2.f32 %v2175_v7 }
 0x590   : > { %v2022_v46 = vpop.f32.mrf.mxu0 }
 0x591   : > { %v2179_v13 = vmul.f32 1.442695, %v2022_v46  ;;  %3138 = vpow2.f32 %v2177_v26 }
 0x592   : > { %v2024_v17 = vpop.f32.mrf.mxu0 }
 0x593   : > { %v2181_v3 = vmul.f32 1.442695, %v2024_v17  ;;  %3140 = vpow2.f32 %v2179_v13 }
 0x594   : > { %v2026_v42 = vpop.f32.mrf.mxu0 }
 0x595   : > { %v2183_v60 = vmul.f32 1.442695, %v2026_v42  ;;  %3142 = vpow2.f32 %v2181_v3 }
 0x596   : > { %v2028_v63 = vpop.f32.mrf.mxu0 }
 0x597   : > { %v2185_v9 = vmul.f32 1.442695, %v2028_v63  ;;  %3144 = vpow2.f32 %v2183_v60 }
 0x598   : > { %v2032_v2 = vpop.f32.mrf.mxu0  ;;  %v4847_v56 = vpop.eup %3132 }
 0x599   : > { %v2187_v41 = vmul.f32 1.442695, %v2032_v2  ;;  %3146 = vpow2.f32 %v2185_v9 }
 0x59a   : > { %v2034_v61 = vpop.f32.mrf.mxu0  ;;  %v4849_v49 = vpop.eup %3134 }
 0x59b   : > { %v2189_v21 = vmul.f32 1.442695, %v2034_v61  ;;  %3148 = vpow2.f32 %v2187_v41 }
 0x59c   : > { %v2036_v8 = vpop.f32.mrf.mxu0  ;;  %v4853_v43 = vpop.eup %3136 }
 0x59d   : > { %v2191_v11 = vmul.f32 1.442695, %v2036_v8  ;;  %3150 = vpow2.f32 %v2189_v21 }
 0x59e   : > { %v2038_v1 = vpop.f32.mrf.mxu0  ;;  %v4855_v16 = vpop.eup %3138 }
 0x59f   : > { %v2193_v54 = vmul.f32 1.442695, %v2038_v1  ;;  %3152 = vpow2.f32 %v2191_v11 }
 0x5a0   : > { %v2042_v51 = vpop.f32.mrf.mxu0  ;;  %v4857_v27 = vpop.eup %3140 }
 0x5a1   : > { %v2195_v29 = vmul.f32 1.442695, %v2042_v51  ;;  %3154 = vpow2.f32 %v2193_v54 }
 0x5a2   : > { %v2044_v28 = vpop.f32.mrf.mxu0  ;;  %v4859_v12 = vpop.eup %3142 }
 0x5a3   : > { %v2197_v25 = vmul.f32 1.442695, %v2044_v28  ;;  %3156 = vpow2.f32 %v2195_v29 }
 0x5a4   : > { %v2046_v37 = vpop.f32.mrf.mxu0  ;;  %v4862_v17 = vpop.eup %3144 }
 0x5a5   : > { %v2199_v34 = vmul.f32 1.442695, %v2046_v37  ;;  %3158 = vpow2.f32 %v2197_v25 }
 0x5a6   : > { %v2048_v50 = vpop.f32.mrf.mxu0  ;;  %v4865_v63 = vpop.eup %3146 }
 0x5a7   : > { %v2201_v48 = vmul.f32 1.442695, %v2048_v50  ;;  %3160 = vpow2.f32 %v2199_v34 }
 0x5a8   : > { %v2052_v14 = vpop.f32.mrf.mxu0  ;;  %v4868_v8 = vpop.eup %3148 }
 0x5a9   : > { %v2203_v40 = vmul.f32 1.442695, %v2052_v14  ;;  %3162 = vpow2.f32 %v2201_v48 }
 0x5aa   : > { %v2054_v22 = vpop.f32.mrf.mxu0  ;;  %v4871_v51 = vpop.eup %3150 }
 0x5ab   : > { %v2205_v35 = vmul.f32 1.442695, %v2054_v22  ;;  %3164 = vpow2.f32 %v2203_v40 }
 0x5ac   : > { %v2056_v19 = vpop.f32.mrf.mxu0  ;;  %v4876_v50 = vpop.eup %3152 }
 0x5ad   : > { %v2207_v47 = vmul.f32 1.442695, %v2056_v19  ;;  %3166 = vpow2.f32 %v2205_v35 }
 0x5ae   : > { %v2058_v15 = vpop.f32.mrf.mxu0  ;;  %v4879_v22 = vpop.eup %3154 }
 0x5af   : > { %v2209_v30 = vmul.f32 1.442695, %v2058_v15  ;;  %3168 = vpow2.f32 %v2207_v47  ;;  %v5246_v47 = vld [vmem:[#allocation9_spill] sm:$0xff] }
 0x5b0   : > { %v2062_v4 = vpop.f32.mrf.mxu0 }
 0x5b1   : > { %v2211_v5 = vmul.f32 1.442695, %v2062_v4  ;;  %3170 = vpow2.f32 %v2209_v30  ;;  %v4884_v4 = vpop.eup %3156  ;;  %v5247_v30 = vld [vmem:[#allocation10_spill] sm:$0xff] }
 0x5b2   : > { %v2064_v10 = vpop.f32.mrf.mxu0 }
 0x5b3   : > { %v2213_v39 = vmul.f32 1.442695, %v2064_v10  ;;  %3172 = vpow2.f32 %v2211_v5  ;;  %v2300_v5 = vmul.f32 %v4849_v49, %v5247_v30  ;;  %v4950_v49 = vmul.f32 %v4859_v12, %v5247_v30 }
 0x5b4   : > { %v4817_v59 = vpop.f32.mrf.mxu0  ;;  %v4967_v12 = vmul.f32 %v4868_v8, %v5246_v47 }
 0x5b5   : > { %v2215_v33 = vmul.f32 1.442695, %v4817_v59  ;;  %3174 = vpow2.f32 %v2213_v39  ;;  %v4887_v59 = vpop.eup %3158 }
 0x5b6   : > { %v4819_v32 = vpop.f32.mrf.mxu0 }
 0x5b7   : > { %v2217_v42 = vmul.f32 1.442695, %v4819_v32  ;;  %3176 = vpow2.f32 %v2215_v33  ;;  %v2301_v33 = vmul.f32 %v4853_v43, %v5246_v47  ;;  %v4956_v43 = vmul.f32 %v4862_v17, %v5246_v47 }
 0x5b8   : > { %v4821_v55 = vpop.f32.mrf.mxu0 }
 0x5b9   : > { %v2219_v2 = vmul.f32 1.442695, %v4821_v55  ;;  %3178 = vpow2.f32 %v2217_v42 }
 0x5ba   : > { %v4823_v52 = vpop.f32.mrf.mxu0 }
 0x5bb   : > { %v2221_v1 = vmul.f32 1.442695, %v4823_v52  ;;  %3180 = vpow2.f32 %v2219_v2  ;;  %v4892_v52 = vpop.eup %3160 }
 0x5bc   : > { %v4825_v24 = vpop.f32.mrf.mxu0 }
 0x5bd   : > { %v2223_v28 = vmul.f32 1.442695, %v4825_v24  ;;  %3182 = vpow2.f32 %v2221_v1 }
 0x5be   : > { %v4827_v44 = vpop.f32.mrf.mxu0 }
 0x5bf   : > { %v2225_v14 = vmul.f32 1.442695, %v4827_v44  ;;  %3184 = vpow2.f32 %v2223_v28  ;;  %v4895_v44 = vpop.eup %3162 }
 0x5c0   : > { %v4829_v18 = vpop.f32.mrf.mxu0  ;;  %v4900_v23 = vpop.eup %3164 }
 0x5c1   : > { %v2227_v19 = vmul.f32 1.442695, %v4829_v18  ;;  %3186 = vpow2.f32 %v2225_v14 }
 0x5c2   : > { %v4831_v31 = vpop.f32.mrf.mxu0 }
 0x5c3   : > { %v2229_v10 = vmul.f32 1.442695, %v4831_v31  ;;  %3188 = vpow2.f32 %v2227_v19  ;;  %v4903_v31 = vpop.eup %3166  ;;  %v4971_v19 = vmul.f32 %v4871_v51, %v5247_v30  ;;  %v4984_v51 = vmul.f32 %v4879_v22, %v5247_v30 }
 0x5c4   : > { %v4833_v0 = vpop.f32.mrf.mxu0 }
 0x5c5   : > { %v2231_v32 = vmul.f32 1.442695, %v4833_v0  ;;  %3190 = vpow2.f32 %v2229_v10  ;;  %v4908_v0 = vpop.eup %3168 }
 0x5c6   : > { %v4835_v58 = vpop.f32.mrf.mxu0  ;;  %v4911_v60 = vpop.eup %3170 }
 0x5c7   : > { %v2233_v24 = vmul.f32 1.442695, %v4835_v58  ;;  %3192 = vpow2.f32 %v2231_v32  ;;  %v4916_v41 = vpop.eup %3172 }
 0x5c8   : > { %v4837_v36 = vpop.f32.mrf.mxu0  ;;  %v4919_v21 = vpop.eup %3174 }
 0x5c9   : > { %v2235_v57 = vmul.f32 1.442695, %v4837_v36  ;;  %3194 = vpow2.f32 %v2233_v24  ;;  %v4923_v54 = vpop.eup %3176 }
 0x5ca   : > { %v4839_v38 = vpop.f32.mrf.mxu0  ;;  %v4925_v29 = vpop.eup %3178 }
 0x5cb   : > { %v2237_v7 = vmul.f32 1.442695, %v4839_v38  ;;  %3196 = vpow2.f32 %v2235_v57  ;;  %v4927_v34 = vpop.eup %3180 }
 0x5cc   : > { %v4841_v62 = vpop.f32.mrf.mxu0  ;;  %v4929_v48 = vpop.eup %3182 }
 0x5cd   : > { %v2239_v26 = vmul.f32 1.442695, %v4841_v62  ;;  %3198 = vpow2.f32 %v2237_v7  ;;  %v4931_v35 = vpop.eup %3184  ;;  %v5249_v7 = vld [vmem:[#allocation12_spill] sm:$0xff] }
 0x5ce   : > { %v4843_v20 = vpop.f32.mrf.mxu0  ;;  %v4937_v39 = vpop.eup %3186  ;;  %v2318_v22 = vmul.f32 %v4911_v60, %v5249_v7 }
 0x5cf   : > { %v2241_v3 = vmul.f32 1.442695, %v4843_v20  ;;  %3200 = vpow2.f32 %v2239_v26  ;;  %v2316_v26 = vmul.f32 %v4903_v31, %v5249_v7 }
 0x5d0   : > { %v4845_v45 = vpop.f32.mrf.mxu0 }
 0x5d1   : > { %v2243_v58 = vmul.f32 1.442695, %v4845_v45  ;;  %3202 = vpow2.f32 %v2241_v3 }
 0x5d2   : > { %v4851_v6 = vpop.f32.mrf.mxu0 }
 0x5d3   : > { %v2245_v36 = vmul.f32 1.442695, %v4851_v6  ;;  %3204 = vpow2.f32 %v2243_v58  ;;  %v2299_v6 = vmul.f32 %v4847_v56, %v5246_v47  ;;  %v2303_v56 = vmul.f32 %v4857_v27, %v5246_v47 }
 0x5d4   : > { %v2106_v53 = vpop.f32.mrf.mxu0 }
 0x5d5   : > { %v2247_v11 = vmul.f32 1.442695, %v2106_v53  ;;  %3206 = vpow2.f32 %v2245_v36 }
 0x5d6   : > { %v2108_v46 = vpop.f32.mrf.mxu0 }
 0x5d7   : > { %v2249_v62 = vmul.f32 1.442695, %v2108_v46  ;;  %3208 = vpow2.f32 %v2247_v11  ;;  %v2302_v46 = vmul.f32 %v4855_v16, %v5247_v30  ;;  %v4960_v16 = vmul.f32 %v4865_v63, %v5247_v30 }
 0x5d8   : > { %v2112_v61 = vpop.f32.mrf.mxu0  ;;  %v4977_v63 = vmul.f32 %v4876_v50, %v5246_v47  ;;  %v4990_v50 = vmul.f32 %v4884_v4, %v5246_v47  ;;  %v5001_v4 = vmul.f32 %v4887_v59, %v5247_v30 }
 0x5d9   : > { %v2251_v40 = vmul.f32 1.442695, %v2112_v61  ;;  %v4944_v61 = vpop.eup %3188 }
 0x5da   : > { %v4874_v37 = vpop.f32.mrf.mxu0  ;;  %v4952_v28 = vpop.eup %3190 }
 0x5db   : > { %v2253_v42 = vmul.f32 1.442695, %v4874_v37  ;;  %v4963_v14 = vpop.eup %3192 }
 0x5dc   : > { %v4882_v15 = vpop.f32.mrf.mxu0  ;;  %v4973_v10 = vpop.eup %3194 }
 0x5dd   : > { %v2255_v37 = vmul.f32 1.442695, %v4882_v15  ;;  %v5248_v15 = vld [vmem:[#allocation11_spill] sm:$0xff]  ;;  %v3197_v57 = vpop.eup %3196 }
 0x5de   : > { %v4890_v55 = vpop.f32.mrf.mxu0  ;;  %v2315_v32 = vmul.f32 %v4900_v23, %v5248_v15  ;;  %v3199_v58 = vpop.eup %3198  ;;  %v2317_v23 = vmul.f32 %v4908_v0, %v5248_v15  ;;  %v2319_v31 = vmul.f32 %v4916_v41, %v5248_v15 }
 0x5df   : > { %v2257_v24 = vmul.f32 1.442695, %v4890_v55  ;;  %v3201_v11 = vpop.eup %3200 }
 0x5e0   : > { %v4898_v18 = vpop.f32.mrf.mxu0  ;;  %v2369_v41 = vadd.f32 %v2317_v23, %v2301_v33 }
 0x5e1   : > { %v2259_v55 = vmul.f32 1.442695, %v4898_v18 }
 0x5e2   : > { %v4906_v13 = vpop.f32.mrf.mxu0 }
 0x5e3   : > { %v2261_v0 = vmul.f32 1.442695, %v4906_v13 }
 0x5e4   : > { %v4914_v9 = vpop.f32.mrf.mxu0 }
 0x5e6   : > { %v4921_v38 = vpop.f32.mrf.mxu0 }
 0x5e7   : > { %v2265_v33 = vmul.f32 1.442695, %v4921_v38 }
 0x5e8   : > { %v2132_v25 = vpop.f32.mrf.mxu0 }
 0x5e9   : > { %v2267_v20 = vmul.f32 1.442695, %v2132_v25  ;;  %v3203_v25 = vpop.eup %3202 }
 0x5ea   : > { %v2134_v45 = vpop.f32.mrf.mxu0 }
 0x5eb   : > { %3210 = vpow2.f32 %v2267_v20  ;;  %v2269_v53 = vmul.f32 1.442695, %v2134_v45  ;;  %v2363_v20 = vadd.f32 %v2315_v32, %v2299_v6  ;;  %v2366_v45 = vadd.f32 %v2316_v26, %v2300_v5 }
 0x5ec   : > { %3212 = vpow2.f32 %v2249_v62  ;;  %v2136_v2 = vpop.f32.mrf.mxu0  ;;  %v2372_v6 = vadd.f32 %v2318_v22, %v2302_v46  ;;  %v2375_v32 = vadd.f32 %v2319_v31, %v2303_v56  ;;  %v2320_v5 = vmul.f32 %v4919_v21, %v5249_v7  ;;  %v5253_v31 = vld [vmem:[#allocation33_spill] sm:$0xff] }
 0x5ed   : > { %3214 = vpow2.f32 %v2269_v53  ;;  %v2271_v1 = vmul.f32 1.442695, %v2136_v2  ;;  %v5250_v53 = vld [vmem:[#allocation19_spill] sm:$0xff]  ;;  %v2321_v56 = vmul.f32 %v4923_v54, %v5248_v15 }
 0x5ee   : > { %3216 = vpow2.f32 %v2251_v40  ;;  %v2138_v27 = vpop.f32.mrf.mxu0  ;;  %v3205_v40 = vpop.eup %3204 }
 0x5ef   : > { %3218 = vpow2.f32 %v2271_v1  ;;  %v2273_v17 = vmul.f32 1.442695, %v2138_v27  ;;  %v3207_v2 = vpop.eup %3206  ;;  %v5251_v1 = vld [vmem:[#allocation24_spill] sm:$0xff]  ;;  %v2263_v27 = vmul.f32 1.442695, %v4914_v9 }
 0x5f0   : > { %3220 = vpow2.f32 %v2253_v42  ;;  %v2142_v8 = vpop.f32.mrf.mxu0  ;;  %v2331_v42 = vmul.f32 %v3197_v57, %v5250_v53 }
 0x5f1   : > { %3222 = vpow2.f32 %v2273_v17  ;;  %v2275_v3 = vmul.f32 1.442695, %v2142_v8  ;;  %v3209_v17 = vpop.eup %3208  ;;  %v2333_v8 = vmul.f32 %v3201_v11, %v5250_v53 }
 0x5f2   : > { %3224 = vpow2.f32 %v2255_v37  ;;  %v2144_v36 = vpop.f32.mrf.mxu0  ;;  %v2332_v37 = vmul.f32 %v3199_v58, %v5251_v1  ;;  %v5252_v58 = vld [vmem:[#allocation32_spill] sm:$0xff] }
 0x5f3   : > { %3226 = vpow2.f32 %v2275_v3  ;;  %v2277_v62 = vmul.f32 1.442695, %v2144_v36  ;;  %v2364_v3 = vadd.f32 %v2363_v20, %v2331_v42  ;;  %v2334_v36 = vmul.f32 %v3203_v25, %v5251_v1 }
 0x5f4   : > { %3228 = vpow2.f32 %v2257_v24  ;;  %v2146_v18 = vpop.f32.mrf.mxu0  ;;  %v2335_v42 = vmul.f32 %v3205_v40, %v5250_v53 }
 0x5f5   : > { %3230 = vpow2.f32 %v2277_v62  ;;  %v2279_v60 = vmul.f32 1.442695, %v2146_v18  ;;  %v2370_v18 = vadd.f32 %v2369_v41, %v2333_v8 }
 0x5f6   : > { %3232 = vpow2.f32 %v2259_v55  ;;  %v2148_v59 = vpop.f32.mrf.mxu0  ;;  %v2367_v55 = vadd.f32 %v2366_v45, %v2332_v37 }
 0x5f7   : > { %3234 = vpow2.f32 %v2279_v60  ;;  %v2281_v13 = vmul.f32 1.442695, %v2148_v59  ;;  %v2381_v59 = vadd.f32 %v2321_v56, %v4956_v43 }
 0x5f8   : > { %v3211_v24 = vpop.eup %3210  ;;  %3236 = vpow2.f32 %v2261_v0  ;;  %v2152_v57 = vpop.f32.mrf.mxu0  ;;  %v2378_v0 = vadd.f32 %v2320_v5, %v4950_v49 }
 0x5f9   : > { %v3213_v26 = vpop.eup %3212  ;;  %v2347_v9 = vmul.f32 %v3211_v24, %v5252_v58  ;;  %3238 = vpow2.f32 %v2281_v13  ;;  %v2283_v23 = vmul.f32 1.442695, %v2152_v57  ;;  %v2373_v13 = vadd.f32 %v2372_v6, %v2334_v36 }
 0x5fa   : > { %v3215_v46 = vpop.eup %3214  ;;  %3240 = vpow2.f32 %v2263_v27  ;;  %v2154_v21 = vpop.f32.mrf.mxu0  ;;  %v2336_v24 = vmul.f32 %v3207_v2, %v5251_v1  ;;  %v2322_v57 = vmul.f32 %v4925_v29, %v5249_v7 }
 0x5fb   : > { %v3217_v11 = vpop.eup %3216  ;;  %v2365_v22 = vadd.f32 %v2364_v3, %v2347_v9  ;;  %v2348_v38 = vmul.f32 %v3215_v46, %v5253_v31  ;;  %3242 = vpow2.f32 %v2283_v23  ;;  %v2285_v62 = vmul.f32 1.442695, %v2154_v21 }
 0x5fc   : > { %v3219_v20 = vpop.eup %3218  ;;  %3244 = vpow2.f32 %v2265_v33  ;;  %v2156_v60 = vpop.f32.mrf.mxu0  ;;  %v2376_v3 = vadd.f32 %v2375_v32, %v2335_v42  ;;  %v2337_v9 = vmul.f32 %v3209_v17, %v5250_v53  ;;  %v2379_v36 = vadd.f32 %v2378_v0, %v2336_v24 }
 0x5fd   : > { %v5018_v54 = vpop.eup %3220  ;;  %3246 = vlog2.f32 %v2365_v22  ;;  %v2368_v25 = vadd.f32 %v2367_v55, %v2348_v38  ;;  %v2349_v45 = vmul.f32 %v3219_v20, %v5252_v58  ;;  %v2287_v37 = vmul.f32 1.442695, %v2156_v60 }
 0x5fe   : > { %v3223_v27 = vpop.eup %3222  ;;  %3248 = vpow2.f32 %v2285_v62  ;;  %v2158_v49 = vpop.f32.mrf.mxu0  ;;  %v2323_v55 = vmul.f32 %v4927_v34, %v5248_v15  ;;  %v2338_v21 = vmul.f32 %v3213_v26, %v5251_v1  ;;  %v2384_v20 = vadd.f32 %v2322_v57, %v4960_v16 }
 0x5ff   : > { %v3225_v41 = vpop.eup %3224  ;;  %3250 = vlog2.f32 %v2368_v25  ;;  %v2371_v40 = vadd.f32 %v2370_v18, %v2349_v45  ;;  %v2350_v5 = vmul.f32 %v3223_v27, %v5253_v31  ;;  %v2289_v8 = vmul.f32 1.442695, %v2158_v49 }
 0x600   : > { %v3227_v33 = vpop.eup %3226  ;;  %3252 = vpow2.f32 %v2287_v37  ;;  %v2162_v43 = vpop.f32.mrf.mxu0  ;;  %v2382_v18 = vadd.f32 %v2381_v59, %v2337_v9  ;;  %v2339_v42 = vmul.f32 %v3217_v11, %v5250_v53  ;;  %v2387_v37 = vadd.f32 %v2323_v55, %v4967_v12 }
 0x601   : > { %v3229_v6 = vpop.eup %3228  ;;  %3254 = vlog2.f32 %v2371_v40  ;;  %v2374_v2 = vadd.f32 %v2373_v13, %v2350_v5  ;;  %v2351_v23 = vmul.f32 %v3227_v33, %v5252_v58  ;;  %v2291_v46 = vmul.f32 1.442695, %v2162_v43 }
 0x602   : > { %v3231_v56 = vpop.eup %3230  ;;  %3256 = vpow2.f32 %v2289_v8  ;;  %v2164_v29 = vpop.f32.mrf.mxu0  ;;  %v2324_v27 = vmul.f32 %v4929_v48, %v5249_v7  ;;  %v2385_v13 = vadd.f32 %v2384_v20, %v2338_v21  ;;  %v2313_v5 = vmul.f32 %v4892_v52, %v5246_v47 }
 0x603   : > { %v3233_v32 = vpop.eup %3232  ;;  %3258 = vlog2.f32 %v2374_v2  ;;  %v2377_v17 = vadd.f32 %v2376_v3, %v2351_v23  ;;  %v2352_v22 = vmul.f32 %v3231_v56, %v5253_v31  ;;  %v2293_v38 = vmul.f32 1.442695, %v2164_v29 }
 0x604   : > { %v3235_v62 = vpop.eup %3234  ;;  %3260 = vpow2.f32 %v2291_v46  ;;  %v2166_v60 = vpop.f32.mrf.mxu0  ;;  %v2325_v8 = vmul.f32 %v4931_v35, %v5248_v15  ;;  %v2340_v12 = vmul.f32 %v5018_v54, %v5251_v1  ;;  %v2388_v33 = vadd.f32 %v2387_v37, %v2339_v42 }
 0x605   : > { %v3237_v34 = vpop.eup %3236  ;;  %3262 = vlog2.f32 %v2377_v17  ;;  %v2380_v0 = vadd.f32 %v2379_v36, %v2352_v22  ;;  %v2353_v26 = vmul.f32 %v3235_v62, %v5252_v58  ;;  %v2295_v25 = vmul.f32 1.442695, %v2166_v60 }
 0x606   : > { %v3239_v45 = vpop.eup %3238  ;;  %3264 = vpow2.f32 %v2293_v38  ;;  %v2168_v16 = vpop.f32.mrf.mxu0  ;;  %v2390_v43 = vadd.f32 %v2324_v27, %v4971_v19  ;;  %v2326_v2 = vmul.f32 %v4937_v39, %v5249_v7  ;;  %v2341_v52 = vmul.f32 %v3225_v41, %v5250_v53 }
 0x607   : > { %v3241_v59 = vpop.eup %3240  ;;  %3266 = vlog2.f32 %v2380_v0  ;;  %v2383_v11 = vadd.f32 %v2382_v18, %v2353_v26  ;;  %v2354_v24 = vmul.f32 %v3239_v45, %v5253_v31  ;;  %v2297_v49 = vmul.f32 1.442695, %v2168_v16 }
 0x608   : > { %v3243_v40 = vpop.eup %3242  ;;  %3268 = vpow2.f32 %v2295_v25  ;;  %v2327_v47 = vmul.f32 %v4944_v61, %v5248_v15  ;;  %v2393_v56 = vadd.f32 %v2325_v8, %v4977_v63  ;;  %v2391_v55 = vadd.f32 %v2390_v43, %v2340_v12 }
 0x609   : > { %v3245_v48 = vpop.eup %3244  ;;  %3270 = vlog2.f32 %v2383_v11  ;;  %v2386_v57 = vadd.f32 %v2385_v13, %v2354_v24  ;;  %v2355_v3 = vmul.f32 %v3243_v40, %v5252_v58  ;;  %v2342_v19 = vmul.f32 %v3229_v6, %v5251_v1 }
 0x60a   : > { %v3247_v9 = vpop.eup %3246  ;;  %3272 = vpow2.f32 %v2297_v49  ;;  %v2328_v41 = vmul.f32 %v4952_v28, %v5249_v7  ;;  %v2343_v21 = vmul.f32 %v3233_v32, %v5250_v53  ;;  %v2396_v29 = vadd.f32 %v2326_v2, %v4984_v51 }
 0x60b   : > { %v3249_v35 = vpop.eup %3248  ;;  %v2412_v54 = vmul.f32 0.6931472, %v3247_v9  ;;  %3274 = vlog2.f32 %v2386_v57  ;;  %v2389_v23 = vadd.f32 %v2388_v33, %v2355_v3  ;;  %v2394_v6 = vadd.f32 %v2393_v56, %v2341_v52 }
 0x60c   : > { %v3251_v46 = vpop.eup %3250  ;;  %v2356_v36 = vmul.f32 %v3249_v35, %v5253_v31  ;;  %v2399_v28 = vadd.f32 %v2327_v47, %v4990_v50  ;;  %v2329_v32 = vmul.f32 %v4963_v14, %v5248_v15  ;;  %v2344_v62 = vmul.f32 %v3237_v34, %v5251_v1 }
 0x60d   : > { %v3253_v39 = vpop.eup %3252  ;;  %2443 = vst [vmem:[%s5060_s26] sm:$0xff] %v2412_v54  ;;  %v2414_v61 = vmul.f32 0.6931472, %v3251_v46  ;;  %3276 = vlog2.f32 %v2389_v23  ;;  %v2397_v42 = vadd.f32 %v2396_v29, %v2342_v19  ;;  %v2402_v26 = vadd.f32 %v2328_v41, %v5001_v4 }
 0x60e   : > { %v3255_v63 = vpop.eup %3254  ;;  %v2392_v17 = vadd.f32 %v2391_v55, %v2356_v36  ;;  %v2357_v22 = vmul.f32 %v3253_v39, %v5252_v58  ;;  %v2330_v50 = vmul.f32 %v4973_v10, %v5249_v7  ;;  %v2400_v25 = vadd.f32 %v2399_v28, %v2343_v21 }
 0x60f   : > { %v3257_v38 = vpop.eup %3256  ;;  %2444 = vst [vmem:[%s5060_s26 + $0x8] sm:$0xff] %v2414_v61  ;;  %v2416_v20 = vmul.f32 0.6931472, %v3255_v63  ;;  %v2345_v34 = vmul.f32 %v3241_v59, %v5250_v53  ;;  %v2314_v13 = vmul.f32 %v4895_v44, %v5247_v30  ;;  %v2405_v16 = vadd.f32 %v2329_v32, %v2313_v5 }
 0x610   : > { %v3259_v18 = vpop.eup %3258  ;;  %3278 = vlog2.f32 %v2392_v17  ;;  %v2395_v60 = vadd.f32 %v2394_v6, %v2357_v22  ;;  %v2358_v51 = vmul.f32 %v3257_v38, %v5253_v31  ;;  %v2403_v4 = vadd.f32 %v2402_v26, %v2344_v62 }
 0x611   : > { %v3261_v0 = vpop.eup %3260  ;;  %2445 = vst [vmem:[%s5060_s26 + $0x10] sm:$0xff] %v2416_v20  ;;  %v2418_v14 = vmul.f32 0.6931472, %v3259_v18  ;;  %v2346_v7 = vmul.f32 %v3245_v48, %v5251_v1  ;;  %v2408_v49 = vadd.f32 %v2330_v50, %v2314_v13  ;;  %v2406_v12 = vadd.f32 %v2405_v16, %v2345_v34 }
 0x612   : > { %v3263_v15 = vpop.eup %3262  ;;  %3280 = vlog2.f32 %v2395_v60  ;;  %v2398_v45 = vadd.f32 %v2397_v42, %v2358_v51  ;;  %v2359_v37 = vmul.f32 %v3261_v0, %v5252_v58 }
 0x613   : > { %v3265_v27 = vpop.eup %3264  ;;  %2446 = vst [vmem:[%s5060_s26 + $0x18] sm:$0xff] %v2418_v14  ;;  %v2420_v11 = vmul.f32 0.6931472, %v3263_v15  ;;  %v2409_v33 = vadd.f32 %v2408_v49, %v2346_v7 }
 0x614   : > { %v3267_v10 = vpop.eup %3266  ;;  %3282 = vlog2.f32 %v2398_v45  ;;  %v2401_v24 = vadd.f32 %v2400_v25, %v2359_v37  ;;  %v2360_v53 = vmul.f32 %v3265_v27, %v5253_v31 }
 0x615   : > { %v3269_v59 = vpop.eup %3268  ;;  %2447 = vst [vmem:[%s5060_s26 + $0x20] sm:$0xff] %v2420_v11  ;;  %v2422_v40 = vmul.f32 0.6931472, %v3267_v10 }
 0x616   : > { %v3271_v8 = vpop.eup %3270  ;;  %3284 = vlog2.f32 %v2401_v24  ;;  %v2404_v44 = vadd.f32 %v2403_v4, %v2360_v53  ;;  %v2361_v30 = vmul.f32 %v3269_v59, %v5252_v58 }
 0x617   : > { %v3273_v5 = vpop.eup %3272  ;;  %2448 = vst [vmem:[%s5060_s26 + $0x28] sm:$0xff] %v2422_v40  ;;  %v2424_v1 = vmul.f32 0.6931472, %v3271_v8 }
 0x618   : > { %v3275_v48 = vpop.eup %3274  ;;  %3286 = vlog2.f32 %v2404_v44  ;;  %v2407_v57 = vadd.f32 %v2406_v12, %v2361_v30  ;;  %v2362_v3 = vmul.f32 %v3273_v5, %v5253_v31 }
 0x619   : > { %2449 = vst [vmem:[%s5060_s26 + $0x30] sm:$0xff] %v2424_v1  ;;  %v2426_v9 = vmul.f32 0.6931472, %v3275_v48 }
 0x61a   : > { %v3277_v43 = vpop.eup %3276  ;;  %3288 = vlog2.f32 %v2407_v57  ;;  %v2410_v2 = vadd.f32 %v2409_v33, %v2362_v3 }
 0x61b   : > { %2450 = vst [vmem:[%s5060_s26 + $0x38] sm:$0xff] %v2426_v9  ;;  %v2428_v58 = vmul.f32 0.6931472, %v3277_v43 }
 0x61c   : > { %3290 = vlog2.f32 %v2410_v2 }
 0x61d   : > { %v3279_v52 = vpop.eup %3278  ;;  %2451 = vst [vmem:[%s5060_s26 + $0x40] sm:$0xff] %v2428_v58 }
 0x61e   : > { %v2430_v35 = vmul.f32 0.6931472, %v3279_v52 }
 0x61f   : > { %v3281_v47 = vpop.eup %3280 }
 0x620   : > { %2452 = vst [vmem:[%s5060_s26 + $0x48] sm:$0xff] %v2430_v35  ;;  %v2432_v31 = vmul.f32 0.6931472, %v3281_v47 }
 0x621   : > { %v3283_v54 = vpop.eup %3282 }
 0x622   : > { %2453 = vst [vmem:[%s5060_s26 + $0x50] sm:$0xff] %v2432_v31  ;;  %v2434_v23 = vmul.f32 0.6931472, %v3283_v54 }
 0x623   : > { %v3285_v46 = vpop.eup %3284 }
 0x624   : > { %2454 = vst [vmem:[%s5060_s26 + $0x58] sm:$0xff] %v2434_v23  ;;  %v2436_v56 = vmul.f32 0.6931472, %v3285_v46 }
 0x625   : > { %v3287_v55 = vpop.eup %3286 }
 0x626   : > { %2455 = vst [vmem:[%s5060_s26 + $0x60] sm:$0xff] %v2436_v56  ;;  %v2438_v19 = vmul.f32 0.6931472, %v3287_v55 }
 0x627   : > { %v3289_v36 = vpop.eup %3288 }
 0x628   : > { %2456 = vst [vmem:[%s5060_s26 + $0x68] sm:$0xff] %v2438_v19  ;;  %v2440_v39 = vmul.f32 0.6931472, %v3289_v36 }
 0x629   : > { %v3291_v41 = vpop.eup %3290 }
 0x62a   : > { %2457 = vst [vmem:[%s5060_s26 + $0x70] sm:$0xff] %v2440_v39  ;;  %v2442_v21 = vmul.f32 0.6931472, %v3291_v41 }
 0x62c   : > { %2458 = vst [vmem:[%s5060_s26 + $0x78] sm:$0xff] %v2442_v21 }
 0x62d   : > { %3341 = shalt.err (!%p3338_p13)
}
 0x62e   : > { %s3342_s22 = scalar_lea.hbm %s5099_s25, 2048  ;;  %s3346_s26 = scalar_lea.hbm %s5152_s7, 8192 }
 0x62f   : > { %p3343_p1 = scmp.ne.s32.totalorder %s5099_s25, %s3342_s22  ;;  %p3347_p3 = scmp.lt.s32.totalorder %s5099_s25, %s5152_s7 }
 0x630   : > { %p3348_p6 = scmp.lt.s32.totalorder %s3346_s26, %s3342_s22 }
 0x631   : > { %p3344_p0 = pnand %p3343_p1, %p5254_p12 }
 0x632   : > { %p3349_p10 = por %p3348_p6, %p3347_p3 }
 0x633   : > { %p3345_p2 = pneg %p3344_p0 }
 0x635   : > { %p3350_p11 = pnand %p3349_p10, %p3345_p2 }
 0x637   : > { %3353 = shalt.err (!%p3350_p11)
}
 0x638   : > { %s3400_s19 = smov 256   ;;  %s3401_s9 = smov 16  }
 0x639   : > { %2848 = dma.vmem_to_hbm [thread:$0]  (%p5254_p12), %s5101_s10, 2048, %s5099_s25, %s2460_s20, %s3400_s19, %s3400_s19, %s3401_s9  }
 0x63a PF: > { %p2859_p4 = scmp.ge.s32.totalorder %s3392_s30, 2  ;;  %s2498_s13 = sand.u32 1, %s3380_s27  }
 0x63b   : > { %p5255_p5 = scmp.ne.s32.totalorder %s5197_s18, 0  ;;  %s2499_s23 = scalar_lea.sflag [#allocation4], %s2498_s13 }
 0x63d   : > { %p2855_p7 = pnand %p2859_p4, %p5255_p5 }
 0x63f   : > { %p2856_p8 = pneg %p2855_p7 }
 0x641   : > { %3375 = dma.done.wait (%p2856_p8), %s2499_s23, 2048  }
 0x642   : > { %3377 = vsyncadd (%p2856_p8), %s2499_s23, 4294965248  ;;  %s5256_s16 = sld [smem:[#allocation8_spill]]  ;;  %p22_p9 = scmp.ge.s32.totalorder %s3472_s11, 6  }
 0x643   : > { %s5257_s27 = smov %s3384_s28  ;;  %s5258_s28 = smov %s3388_s29 }
 0x644   : > { %s5260_s30 = smov %s3472_s11  ;;  %24 = sbr.rel (!%p22_p9) target bundleno = 5 (0x5), region = 105 }
 0x648   : > { %s5259_s29 = smov %s5256_s16 }
 0x649   :  { %2512 = vsyncpa [#allocation3], 1 }
 0x64a   :  { %2514 = vsyncpa [#allocation3 + $0x1], 1 }
 0x64b   :  { %2515 = vsyncpa [#allocation4], 1 }
 0x64c   :  { %2517 = vsyncpa [#allocation4 + $0x1], 1 }

</bundles_post_ra>
